<compile_context>
chip_gen: v7x
topology: tpu7x:2x2x1
jax: 0.10.0
libtpu: 0.0.40
codegen_flags: <defaults>
</compile_context>

<pallas_src>
import functools

import jax
import jax.numpy as jnp
from jax import lax
from jax.experimental import pallas as pl
from jax.experimental.pallas import tpu as pltpu


def _grad3d_kernel(x_ref, out_ref, carry_ref, *, penalty):
    d = pl.program_id(2)                 # inner "arbitrary" axis (D tiles in shard)

    x = x_ref[...]                       # input dtype; no up-front f32 block copy
    bc_t, tD, H, W = x.shape

    if penalty == 'l2':
        def pen(v):                      # widen only here; accumulation stays f32
            vf = v.astype(jnp.float32)
            return vf * vf
    else:
        def pen(v):                      # |.| is exact in bf16; cast afterwards
            return jnp.abs(v).astype(jnp.float32)

    # Row 0/1/2 of the (8,128) resident accumulator hold the D/H/W partial sums.
    row = lax.broadcasted_iota(jnp.int32, (8, 128), 0)

    # Zero the resident accumulator at the first D tile of this (p, bc) block.
    @pl.when(d == 0)
    def _():
        out_ref[...] = jnp.zeros_like(out_ref)

    # ---- D axis (major axis): plain slices, no relayout ----------------------
    if tD > 1:
        sum_d = jnp.sum(pen(x[:, 1:] - x[:, :-1]))
    else:
        sum_d = 0.0

    # Cross-block D boundary: previous block's last slice lives in the carry.
    # Only processed when there actually is a previous block in this shard.
    @pl.when(d > 0)
    def _():
        b = jnp.sum(pen(x[:, 0:1] - carry_ref[...]))
        out_ref[...] += jnp.where(row == 0, b, 0.0)

    carry_ref[...] = x[:, tD - 1:tD]     # carry stays in the input dtype

    # ---- H axis (sublane axis) ------------------------------------------------
    if H > 1:
        sum_h = jnp.sum(pen(x[:, :, 1:, :] - x[:, :, :-1, :]))
    else:
        sum_h = 0.0

    # ---- W axis (lane axis) ----------------------------------------------------
    if W > 1 and W % 128 == 0 and x.dtype.itemsize == 4:
        # Aligned 32-bit fast path: XLU rotate; wrap term subtracted explicitly
        # so the result is exact regardless of the rotate direction convention.
        x3 = x.reshape(bc_t * tD, H, W)  # merging major dims is free
        rolled = pltpu.roll(x3, 1, 2)
        sum_w = (jnp.sum(pen(x3 - rolled))
                 - jnp.sum(pen(x3[:, :, 0:1] - x3[:, :, W - 1:W])))
    elif W > 1:
        sum_w = jnp.sum(pen(x[:, :, :, 1:] - x[:, :, :, :-1]))
    else:
        sum_w = 0.0

    # Single accumulate into the resident block (two selects on one vreg; cheap).
    out_ref[...] += jnp.where(row == 0, sum_d,
                              jnp.where(row == 1, sum_h, sum_w))


def _largest_divisor_leq(n, cap):
    cap = max(1, min(n, cap))
    for t in range(cap, 0, -1):
        if n % t == 0:
            return t
    return 1


def _round_up(a, b):
    return -(-a // b) * b


def grad3d_loss(y_pred, y_true=None, *, penalty='l1', loss_mult=None,
                target_block_bytes=16 * 1024 * 1024):
    """Pallas TPU implementation of Grad3d.forward (y_true unused, as in torch)."""
    del y_true
    B, C, D, H, W = y_pred.shape
    BC = B * C
    x = y_pred.reshape(BC, D, H, W)

    # Layout: keep the native layout unless the last dim is severely lane-sparse
    # (a transpose costs a full extra HBM read+write of the volume).  The loss is
    # a sum of per-axis means, i.e. invariant under spatial permutation.
    spatial = (D, H, W)
    if W < 8 or (W < 128 and max(D, H) >= 128):
        perm = tuple(sorted(range(3), key=lambda a: (spatial[a], a)))
    else:
        perm = (0, 1, 2)
    if perm != (0, 1, 2):
        x = jnp.transpose(x, (0,) + tuple(1 + p for p in perm))
    Dk, Hk, Wk = (spatial[p] for p in perm)

    itemsize = jnp.dtype(x.dtype).itemsize
    sub_mult = 8 * max(1, 4 // itemsize)                    # sublane packing
    padded_plane_bytes = _round_up(Hk, sub_mult) * _round_up(Wk, 128) * itemsize

    # Tile the leading spatial axis into ~target_block_bytes slabs; if a whole
    # volume is smaller than that, fuse several B*C volumes per block instead
    # (amortises the ~0.35 us per-grid-step overhead).
    tD = _largest_divisor_leq(Dk, max(1, target_block_bytes // padded_plane_bytes))
    if tD == Dk:
        vol_bytes = Dk * padded_plane_bytes
        cap = max(1, target_block_bytes // vol_bytes)
        if BC >= 2:
            cap = min(cap, max(1, BC // 2))    # keep >= 2 parallel tiles (megacore)
        bc_tile = _largest_divisor_leq(BC, cap)
    else:
        bc_tile = 1
    n_bc = BC // bc_tile
    n_d = Dk // tD

    # v7x megacore: with BC == 1 the bc axis cannot be sharded, so split the D
    # tiles into two independent "parallel" shards (separate carries); the one
    # missing inter-shard boundary plane is added back below in the wrapper.
    if n_bc == 1 and n_d >= 2 and n_d % 2 == 0:
        n_p = 2
    else:
        n_p = 1
    n_d_per = n_d // n_p

    # VMEM budget: double-buffered input block + carry + small output, clamped
    # so it stays inside v7x's 64 MiB physical VMEM.
    block_vmem = bc_tile * tD * padded_plane_bytes
    carry_vmem = bc_tile * padded_plane_bytes
    vmem_limit = int(min(64 * 1024 * 1024,
                         max(32 * 1024 * 1024,
                             2 * block_vmem + 2 * carry_vmem + (4 << 20))))

    n_elem = BC * Dk * Hk * Wk
    cost = pl.CostEstimate(flops=9 * n_elem, transcendentals=0,
                           bytes_accessed=n_elem * itemsize
                                          + n_p * n_bc * 8 * 128 * 4)

    kernel = functools.partial(_grad3d_kernel, penalty=penalty)
    partials = pl.pallas_call(
        kernel,
        out_shape=jax.ShapeDtypeStruct((n_p, n_bc, 8, 128), jnp.float32),
        grid_spec=pltpu.PrefetchScalarGridSpec(
            num_scalar_prefetch=0,
            grid=(n_p, n_bc, n_d_per),
            in_specs=[pl.BlockSpec(
                (bc_tile, tD, Hk, Wk),
                lambda p, bc, d: (bc, p * n_d_per + d, 0, 0))],
            out_specs=pl.BlockSpec(
                (None, None, 8, 128),
                lambda p, bc, d: (p, bc, 0, 0)),
            scratch_shapes=[pltpu.VMEM((bc_tile, 1, Hk, Wk), x.dtype)],
        ),
        compiler_params=pltpu.CompilerParams(
            dimension_semantics=("parallel", "parallel", "arbitrary"),
            vmem_limit_bytes=vmem_limit,
        ),
        cost_estimate=cost,
    )(x)

    sum_d = jnp.sum(partials[:, :, 0, 0])
    sum_h = jnp.sum(partials[:, :, 1, 0])
    sum_w = jnp.sum(partials[:, :, 2, 0])

    if n_p == 2:
        # Single inter-shard boundary plane fixed up here (tiny jnp op).
        b = n_d_per * tD
        db = (x[:, b, :, :] - x[:, b - 1, :, :]).astype(jnp.float32)
        db = db * db if penalty == 'l2' else jnp.abs(db)
        sum_d = sum_d + jnp.sum(db)

    cnt_d = BC * (Dk - 1) * Hk * Wk
    cnt_h = BC * Dk * (Hk - 1) * Wk
    cnt_w = BC * Dk * Hk * (Wk - 1)
    # Degenerate (size-1) spatial dims intentionally yield 0/0 -> NaN, matching
    # torch.mean of an empty tensor; do not "fix".
    grad = (sum_d / cnt_d + sum_h / cnt_h + sum_w / cnt_w) / 3.0
    if loss_mult is not None:
        grad = grad * loss_mult
    return grad


def _grad3d_ref(y_pred, penalty='l1', loss_mult=None):
    # Diffs in the input dtype (mirrors the kernel for bf16 inputs), widened to
    # f32 before the penalty / mean.
    dy = (y_pred[:, :, 1:, :, :] - y_pred[:, :, :-1, :, :]).astype(jnp.float32)
    dx = (y_pred[:, :, :, 1:, :] - y_pred[:, :, :, :-1, :]).astype(jnp.float32)
    dz = (y_pred[:, :, :, :, 1:] - y_pred[:, :, :, :, :-1]).astype(jnp.float32)
    dy, dx, dz = jnp.abs(dy), jnp.abs(dx), jnp.abs(dz)
    if penalty == 'l2':
        dy, dx, dz = dy * dy, dx * dx, dz * dz
    d = jnp.mean(dx) + jnp.mean(dy) + jnp.mean(dz)
    grad = d / 3.0
    if loss_mult is not None:
        grad = grad * loss_mult
    return grad


if __name__ == "__main__":
    key = jax.random.PRNGKey(0)
    k1, k2, k3 = jax.random.split(key, 3)

    # voxelmorph-style flow field: batch=2, channels=3 (displacement dims),
    # small 8x16x16 spatial volume.
    y_pred = jax.random.normal(k1, (2, 3, 8, 16, 16), dtype=jnp.float32)
    y_true = jax.random.normal(k2, (2, 3, 8, 16, 16), dtype=jnp.float32)

    out_l1 = jax.block_until_ready(grad3d_loss(y_pred, y_true, penalty='l1'))
    out_l2 = jax.block_until_ready(
        grad3d_loss(y_pred, y_true, penalty='l2', loss_mult=2.0))
    ref_l1 = _grad3d_ref(y_pred, penalty='l1')
    ref_l2 = _grad3d_ref(y_pred, penalty='l2', loss_mult=2.0)
    assert jnp.allclose(out_l1, ref_l1, rtol=1e-5, atol=1e-6), (out_l1, ref_l1)
    assert jnp.allclose(out_l2, ref_l2, rtol=1e-5, atol=1e-6), (out_l2, ref_l2)

    # Exercise the D-axis tiling + VMEM carry path with a tiny block budget.
    out_l1_tiled = jax.block_until_ready(
        grad3d_loss(y_pred, y_true, penalty='l1', target_block_bytes=4096))
    assert jnp.allclose(out_l1_tiled, ref_l1, rtol=1e-5, atol=1e-6), (out_l1_tiled, ref_l1)

    # BC == 1: exercises the 2-way parallel D split (v7x megacore path) and the
    # wrapper-side inter-shard boundary fix.
    y_single = jax.random.normal(k3, (1, 1, 16, 16, 16), dtype=jnp.float32)
    out_s = jax.block_until_ready(
        grad3d_loss(y_single, None, penalty='l2', target_block_bytes=4096))
    ref_s = _grad3d_ref(y_single, penalty='l2')
    assert jnp.allclose(out_s, ref_s, rtol=1e-5, atol=1e-6), (out_s, ref_s)

    # bf16 input: diffs stay in bf16 (VALU), accumulation in f32, bf16 carry.
    y_bf16 = y_pred.astype(jnp.bfloat16)
    out_b = jax.block_until_ready(grad3d_loss(y_bf16, None, penalty='l1'))
    ref_b = _grad3d_ref(y_bf16, penalty='l1')
    assert jnp.allclose(out_b, ref_b, rtol=1e-3, atol=1e-5), (out_b, ref_b)

    print("KERNEL_OK")
</pallas_src>

<mosaic_0001>
module attributes {stable_mosaic.version = 11 : i64} {
  func.func @_grad3d_kernel(%arg0: i32, %arg1: i32, %arg2: i32, %arg3: memref<3x8x16x16xf32, #tpu.memory_space<vmem>>, %arg4: memref<1x1x8x128xf32, #tpu.memory_space<vmem>>, %arg5: memref<3x1x16x16xf32, #tpu.memory_space<vmem>>) attributes {dimension_semantics = [#tpu.dimension_semantics<parallel>, #tpu.dimension_semantics<parallel>, #tpu.dimension_semantics<arbitrary>], iteration_bounds = array<i64: 1, 2, 1>, scalar_prefetch = 0 : i64, scratch_operands = 1 : i64, tpu.core_type = #tpu.core_type<tc>, window_params = [{transform_indices = @transform_0, window_bounds = array<i64: 3, 8, 16, 16>}, {transform_indices = @transform_1, window_bounds = array<i64: 1, 1, 8, 128>}]} {
    %c0 = arith.constant 0 : index
    %c0_0 = arith.constant 0 : index
    %c0_1 = arith.constant 0 : index
    %c0_2 = arith.constant 0 : index
    %0 = vector.load %arg3[%c0, %c0_0, %c0_1, %c0_2] : memref<3x8x16x16xf32, #tpu.memory_space<vmem>>, vector<3x8x16x16xf32>
    %1 = tpu.iota {dimensions = array<i32: 0>} : vector<8x128xi32>
    %c0_i32 = arith.constant 0 : i32
    %2 = arith.cmpi eq, %arg2, %c0_i32 : i32
    %3 = arith.extui %2 : i1 to i32
    %c0_i32_3 = arith.constant 0 : i32
    %4 = arith.cmpi ne, %3, %c0_i32_3 : i32
    scf.if %4 {
      %cst_21 = arith.constant 0.000000e+00 : f32
      %49 = vector.broadcast %cst_21 : f32 to vector<8x128xf32>
      %c0_22 = arith.constant 0 : index
      %c0_23 = arith.constant 0 : index
      %c0_24 = arith.constant 0 : index
      %c0_25 = arith.constant 0 : index
      %50 = vector.load %arg4[%c0_22, %c0_23, %c0_24, %c0_25] : memref<1x1x8x128xf32, #tpu.memory_space<vmem>>, vector<1x1x8x128xf32>
      %51 = vector.shape_cast %50 : vector<1x1x8x128xf32> to vector<8x128xf32>
      %52 = vector.shape_cast %49 : vector<8x128xf32> to vector<1x1x8x128xf32>
      tpu.vector_store %arg4[%c0_22, %c0_23, %c0_24, %c0_25], %52 {strides = array<i32>} : memref<1x1x8x128xf32, #tpu.memory_space<vmem>>, vector<1x1x8x128xf32>,
    } else {
    }
    %5 = vector.extract_strided_slice %0 {offsets = [0, 1, 0, 0], sizes = [3, 7, 16, 16], strides = [1, 1, 1, 1]} : vector<3x8x16x16xf32> to vector<3x7x16x16xf32>
    %6 = vector.extract_strided_slice %0 {offsets = [0, 0, 0, 0], sizes = [3, 7, 16, 16], strides = [1, 1, 1, 1]} : vector<3x8x16x16xf32> to vector<3x7x16x16xf32>
    %7 = arith.subf %5, %6 : vector<3x7x16x16xf32>
    %8 = math.absf %7 : vector<3x7x16x16xf32>
    %9 = vector.shape_cast %8 : vector<3x7x16x16xf32> to vector<1x3x7x16x16xf32>
    %cst = arith.constant dense<0.000000e+00> : vector<1xf32>
    %10 = vector.multi_reduction <add>, %9, %cst [1, 2, 3, 4] : vector<1x3x7x16x16xf32> to vector<1xf32>
    %11 = vector.shape_cast %10 : vector<1xf32> to vector<1x1x1x1x1xf32>
    %12 = vector.extract %11[0, 0, 0, 0, 0] : f32 from vector<1x1x1x1x1xf32>
    %c0_i32_4 = arith.constant 0 : i32
    %13 = arith.cmpi sgt, %arg2, %c0_i32_4 : i32
    %14 = arith.extui %13 : i1 to i32
    %c0_i32_5 = arith.constant 0 : i32
    %15 = arith.cmpi ne, %14, %c0_i32_5 : i32
    scf.if %15 {
      %49 = vector.extract_strided_slice %0 {offsets = [0, 0, 0, 0], sizes = [3, 1, 16, 16], strides = [1, 1, 1, 1]} : vector<3x8x16x16xf32> to vector<3x1x16x16xf32>
      %c0_21 = arith.constant 0 : index
      %c0_22 = arith.constant 0 : index
      %c0_23 = arith.constant 0 : index
      %c0_24 = arith.constant 0 : index
      %50 = vector.load %arg5[%c0_21, %c0_22, %c0_23, %c0_24] : memref<3x1x16x16xf32, #tpu.memory_space<vmem>>, vector<3x1x16x16xf32>
      %51 = arith.subf %49, %50 : vector<3x1x16x16xf32>
      %52 = math.absf %51 : vector<3x1x16x16xf32>
      %53 = vector.shape_cast %52 : vector<3x1x16x16xf32> to vector<1x3x1x16x16xf32>
      %cst_25 = arith.constant dense<0.000000e+00> : vector<1xf32>
      %54 = vector.multi_reduction <add>, %53, %cst_25 [1, 2, 3, 4] : vector<1x3x1x16x16xf32> to vector<1xf32>
      %55 = vector.shape_cast %54 : vector<1xf32> to vector<1x1x1x1x1xf32>
      %56 = vector.extract %55[0, 0, 0, 0, 0] : f32 from vector<1x1x1x1x1xf32>
      %c0_26 = arith.constant 0 : index
      %c0_27 = arith.constant 0 : index
      %c0_28 = arith.constant 0 : index
      %c0_29 = arith.constant 0 : index
      %57 = vector.load %arg4[%c0_26, %c0_27, %c0_28, %c0_29] : memref<1x1x8x128xf32, #tpu.memory_space<vmem>>, vector<1x1x8x128xf32>
      %58 = vector.shape_cast %57 : vector<1x1x8x128xf32> to vector<8x128xf32>
      %c0_i32_30 = arith.constant 0 : i32
      %59 = vector.broadcast %c0_i32_30 : i32 to vector<8x128xi32>
      %60 = arith.cmpi eq, %1, %59 : vector<8x128xi32>
      %cst_31 = arith.constant 0.000000e+00 : f32
      %61 = vector.broadcast %56 : f32 to vector<8x128xf32>
      %62 = vector.broadcast %cst_31 : f32 to vector<8x128xf32>
      %63 = arith.select %60, %61, %62 : vector<8x128xi1>, vector<8x128xf32>
      %64 = arith.addf %58, %63 : vector<8x128xf32>
      %c0_32 = arith.constant 0 : index
      %c0_33 = arith.constant 0 : index
      %c0_34 = arith.constant 0 : index
      %c0_35 = arith.constant 0 : index
      %65 = vector.load %arg4[%c0_32, %c0_33, %c0_34, %c0_35] : memref<1x1x8x128xf32, #tpu.memory_space<vmem>>, vector<1x1x8x128xf32>
      %66 = vector.shape_cast %65 : vector<1x1x8x128xf32> to vector<8x128xf32>
      %67 = vector.shape_cast %64 : vector<8x128xf32> to vector<1x1x8x128xf32>
      tpu.vector_store %arg4[%c0_32, %c0_33, %c0_34, %c0_35], %67 {strides = array<i32>} : memref<1x1x8x128xf32, #tpu.memory_space<vmem>>, vector<1x1x8x128xf32>,
    } else {
    }
    %16 = vector.extract_strided_slice %0 {offsets = [0, 7, 0, 0], sizes = [3, 1, 16, 16], strides = [1, 1, 1, 1]} : vector<3x8x16x16xf32> to vector<3x1x16x16xf32>
    %c0_6 = arith.constant 0 : index
    %c0_7 = arith.constant 0 : index
    %c0_8 = arith.constant 0 : index
    %c0_9 = arith.constant 0 : index
    %17 = vector.load %arg5[%c0_6, %c0_7, %c0_8, %c0_9] : memref<3x1x16x16xf32, #tpu.memory_space<vmem>>, vector<3x1x16x16xf32>
    tpu.vector_store %arg5[%c0_6, %c0_7, %c0_8, %c0_9], %16 {strides = array<i32>} : memref<3x1x16x16xf32, #tpu.memory_space<vmem>>, vector<3x1x16x16xf32>,
    %18 = vector.extract_strided_slice %0 {offsets = [0, 0, 1, 0], sizes = [3, 8, 15, 16], strides = [1, 1, 1, 1]} : vector<3x8x16x16xf32> to vector<3x8x15x16xf32>
    %19 = vector.extract_strided_slice %0 {offsets = [0, 0, 0, 0], sizes = [3, 8, 15, 16], strides = [1, 1, 1, 1]} : vector<3x8x16x16xf32> to vector<3x8x15x16xf32>
    %20 = arith.subf %18, %19 : vector<3x8x15x16xf32>
    %21 = math.absf %20 : vector<3x8x15x16xf32>
    %22 = vector.shape_cast %21 : vector<3x8x15x16xf32> to vector<1x3x8x15x16xf32>
    %cst_10 = arith.constant dense<0.000000e+00> : vector<1xf32>
    %23 = vector.multi_reduction <add>, %22, %cst_10 [1, 2, 3, 4] : vector<1x3x8x15x16xf32> to vector<1xf32>
    %24 = vector.shape_cast %23 : vector<1xf32> to vector<1x1x1x1x1xf32>
    %25 = vector.extract %24[0, 0, 0, 0, 0] : f32 from vector<1x1x1x1x1xf32>
    %26 = vector.extract_strided_slice %0 {offsets = [0, 0, 0, 1], sizes = [3, 8, 16, 15], strides = [1, 1, 1, 1]} : vector<3x8x16x16xf32> to vector<3x8x16x15xf32>
    %27 = vector.extract_strided_slice %0 {offsets = [0, 0, 0, 0], sizes = [3, 8, 16, 15], strides = [1, 1, 1, 1]} : vector<3x8x16x16xf32> to vector<3x8x16x15xf32>
    %28 = arith.subf %26, %27 : vector<3x8x16x15xf32>
    %29 = math.absf %28 : vector<3x8x16x15xf32>
    %30 = vector.shape_cast %29 : vector<3x8x16x15xf32> to vector<1x3x8x16x15xf32>
    %cst_11 = arith.constant dense<0.000000e+00> : vector<1xf32>
    %31 = vector.multi_reduction <add>, %30, %cst_11 [1, 2, 3, 4] : vector<1x3x8x16x15xf32> to vector<1xf32>
    %32 = vector.shape_cast %31 : vector<1xf32> to vector<1x1x1x1x1xf32>
    %33 = vector.extract %32[0, 0, 0, 0, 0] : f32 from vector<1x1x1x1x1xf32>
    %c0_12 = arith.constant 0 : index
    %c0_13 = arith.constant 0 : index
    %c0_14 = arith.constant 0 : index
    %c0_15 = arith.constant 0 : index
    %34 = vector.load %arg4[%c0_12, %c0_13, %c0_14, %c0_15] : memref<1x1x8x128xf32, #tpu.memory_space<vmem>>, vector<1x1x8x128xf32>
    %35 = vector.shape_cast %34 : vector<1x1x8x128xf32> to vector<8x128xf32>
    %c0_i32_16 = arith.constant 0 : i32
    %36 = vector.broadcast %c0_i32_16 : i32 to vector<8x128xi32>
    %37 = arith.cmpi eq, %1, %36 : vector<8x128xi32>
    %c1_i32 = arith.constant 1 : i32
    %38 = vector.broadcast %c1_i32 : i32 to vector<8x128xi32>
    %39 = arith.cmpi eq, %1, %38 : vector<8x128xi32>
    %40 = vector.broadcast %25 : f32 to vector<8x128xf32>
    %41 = vector.broadcast %33 : f32 to vector<8x128xf32>
    %42 = arith.select %39, %40, %41 : vector<8x128xi1>, vector<8x128xf32>
    %43 = vector.broadcast %12 : f32 to vector<8x128xf32>
    %44 = arith.select %37, %43, %42 : vector<8x128xi1>, vector<8x128xf32>
    %45 = arith.addf %35, %44 : vector<8x128xf32>
    %c0_17 = arith.constant 0 : index
    %c0_18 = arith.constant 0 : index
    %c0_19 = arith.constant 0 : index
    %c0_20 = arith.constant 0 : index
    %46 = vector.load %arg4[%c0_17, %c0_18, %c0_19, %c0_20] : memref<1x1x8x128xf32, #tpu.memory_space<vmem>>, vector<1x1x8x128xf32>
    %47 = vector.shape_cast %46 : vector<1x1x8x128xf32> to vector<8x128xf32>
    %48 = vector.shape_cast %45 : vector<8x128xf32> to vector<1x1x8x128xf32>
    tpu.vector_store %arg4[%c0_17, %c0_18, %c0_19, %c0_20], %48 {strides = array<i32>} : memref<1x1x8x128xf32, #tpu.memory_space<vmem>>, vector<1x1x8x128xf32>,
    return
  }
  func.func @transform_0(%arg0: i32, %arg1: i32, %arg2: i32) -> (i32, i32, i32, i32) {
    %c1_i32 = arith.constant 1 : i32
    %0 = arith.muli %arg0, %c1_i32 : i32
    %1 = arith.addi %0, %arg2 : i32
    %c0_i32 = arith.constant 0 : i32
    %c0_i32_0 = arith.constant 0 : i32
    %c0_i32_1 = arith.constant 0 : i32
    return %arg1, %1, %c0_i32, %c0_i32_0 : i32, i32, i32, i32
  }
  func.func @transform_1(%arg0: i32, %arg1: i32, %arg2: i32) -> (i32, i32, i32, i32) {
    %c0_i32 = arith.constant 0 : i32
    %c0_i32_0 = arith.constant 0 : i32
    %c0_i32_1 = arith.constant 0 : i32
    return %arg0, %arg1, %c0_i32, %c0_i32_0 : i32, i32, i32, i32
  }
}

</mosaic_0001>

<bundles_post_ra>
// kernel: tpu_custom_call.1
= control target key start
LH: loop header
LB: loop body
LE: loop exit
PB: predicated region body
PF: predicated region fallthrough
CT: control target
= control target key end

     0   :  { %6 = vsyncpa [#allocation4], 0  ;;  %s2875_s0 = inlined_call_operand.hbm [shape: f32[6,8,16,16], index: 0, kind: input, shape index: {}]   ;;  %s2876_s1 = inlined_call_operand.hbm [shape: f32[1,2,8,128], index: 1, kind: output, shape index: {}]  }
   0x1   :  { %8 = vsyncpa [#allocation4 + $0x1], 0 }
   0x2   :  { %9 = vsyncpa [#allocation5], 0 }
   0x3   :  { %11 = vsyncpa [#allocation5 + $0x1], 0  ;;  %s1877_s6 = smov 0   ;;  %s1879_s7 = smov 0  }
   0x4   :  { %s1881_s8 = smov 0   ;;  %s1883_s9 = smov 0  }
   0x5   :  { %s1885_s10 = smov 0   ;;  %s1887_s11 = smov 0  }
   0x6 LB: > { %s1643_s12 = sadd.s32 4294967295, %s1859_s11   ;;  %s1644_s13 = sadd.s32 4294967294, %s1859_s11   ;;  %s1859_s11 = sphi %s1887_s11, %s17_s11   ;;  %s1855_s10 = sphi %s1885_s10, %s2913_s10   ;;  %s1851_s9 = sphi %s1883_s9, %s2912_s9   ;;  %s1847_s8 = sphi %s1881_s8, %s2911_s8   ;;  %s1843_s7 = sphi %s1879_s7, %s2910_s7   ;;  %s1839_s6 = sphi %s1877_s6, %s2909_s6  }
   0x7   : > { %s32_s14 = sadd.s32 1, %s1855_s10  ;;  %s47_s15 = sadd.s32 1, %s1847_s8 }
   0x8   : > { %p34_p0 = scmp.ge.s32.totalorder %s32_s14, 2  ;;  %p54_p1 = scmp.ne.s32.totalorder %s1847_s8, %s1843_s7 }
   0x9   : > { %p55_p2 = scmp.eq.s32.totalorder %s1859_s11, 0  ;;  %p60_p3 = scmp.ne.s32.totalorder %s1843_s7, %s1839_s6 }
   0xa   : > { %s2915_s14 = smov (%p34_p0, %s32_s14), 0  ;;  %p61_p5 = scmp.eq.s32.totalorder %s1643_s12, 0 }
   0xb   : > { %p1918_p4 = por %p55_p2, %p54_p1  ;;  %s42_s17 = ssub.s32 %s1855_s10, %s2915_s14 }
   0xc   : > { %p86_p6 = scmp.eq.s32.totalorder %s1643_s12, 1  ;;  %p45_p7 = scmp.eq.s32.totalorder %s42_s17, 0 }
   0xd   : > { %p1924_p8 = por %p61_p5, %p60_p3  ;;  %p92_p10 = scmp.eq.s32.totalorder %s1644_s13, 1 }
   0xe   : > { %p1928_p9 = por %p86_p6, %p54_p1  ;;  %p1678_p13 = scmp.lt.s32.totalorder %s1859_s11, 2 }
   0xf   : > { %s1933_s20 = scalar_select %p45_p7, %s1847_s8, %s47_s15  }
  0x10   : > { %s2888_s19 = scalar_select %p1928_p9, 1, 0 }
  0x11   : > { %p1935_p11 = por %p92_p10, %p60_p3  ;;  %s112_s22 = sand.u32 1, %s1847_s8  }
  0x12   : > { %s1658_s23 = smul.u32 384, %s112_s22  ;;  %p1945_p0 = pnand %p1678_p13, %p1918_p4 }
  0x13   : > { %s2889_s21 = scalar_select %p1935_p11, 1, 0 }
  0x14   : > { %s1657_s24 = smul.u32 6144, %s1855_s10  ;;  %s116_s29 = scalar_lea.vmem [#allocation3], %s1658_s23 }
  0x15   : > { %s128_s30 = sshll.u32 %s116_s29, 4  ;;  %s1957_s2 = scalar_lea.sflag [#allocation4], %s112_s22  ;;  %s1954_s30 = int_to_ptr.vmem [resolvable:$true] %s128_s30 }
  0x16   : > { %s1952_s28 = scalar_lea.hbm %s2875_s0, %s1657_s24  ;;  %p1749_p3 = pneg %p1945_p0 }
  0x17   : > { %s1747_s3 = scalar_lea.hbm %s1952_s28, 6144  ;;  %s1752_s12 = scalar_lea.hbm %s2875_s0, 12288 }
  0x18   : > { %p1748_p2 = scmp.ne.s32.totalorder %s1952_s28, %s1747_s3  ;;  %p1753_p6 = scmp.lt.u32.totalorder %s1952_s28, %s2875_s0 }
  0x19   : > { %p1754_p7 = scmp.lt.u32.totalorder %s1752_s12, %s1747_s3  ;;  %p1756_p13 = scmp.lt.u32.totalorder %s1747_s3, %s1952_s28 }
  0x1a   : > { %p1750_p4 = pnand %p1749_p3, %p1748_p2 }
  0x1b   : > { %p1755_p10 = por %p1754_p7, %p1753_p6 }
  0x1c   : > { %p1751_p5 = pneg %p1750_p4 }
  0x1d   : > { %p1757_p12 = por %p1756_p13, %p1755_p10 }
  0x1f   : > { %p1758_p1 = pnand %p1757_p12, %p1751_p5 }
  0x21   : > { %1761 = shalt.err (!%p1758_p1)
}
  0x22   : > { %s1762_s16 = scalar_lea.vmem %s1954_s30, 6144  ;;  %s1861_s17 = smov [#allocation3]  }
  0x23   : > { %p1763_p2 = scmp.ne.s32.totalorder %s1954_s30, %s1762_s16  ;;  %s1767_s22 = sshll.u32 %s1861_s17, 4  ;;  %s1768_s22 = int_to_ptr.vmem [resolvable:$false] %s1767_s22 }
  0x24   : > { %s1769_s23 = scalar_lea.vmem %s1768_s22, 12288  ;;  %p1770_p9 = scmp.lt.s32.totalorder %s1954_s30, %s1768_s22 }
  0x25   : > { %p1765_p4 = pnand %p1763_p2, %p1749_p3  ;;  %p1771_p6 = scmp.lt.s32.totalorder %s1769_s23, %s1762_s16 }
  0x27   : > { %p1766_p11 = pneg %p1765_p4  ;;  %p1772_p7 = por %p1771_p6, %p1770_p9 }
  0x29   : > { %p1773_p10 = pnand %p1772_p7, %p1766_p11 }
  0x2b   : > { %1776 = shalt.err (!%p1773_p10)
}
  0x2c   : > { %s1862_s24 = smov 128   ;;  %s1863_s26 = smov 8  }
  0x2d   : > { %1673 = dma.hbm_to_vmem [thread:$0]  (!%p1945_p0), %s1952_s28, 6144, %s1954_s30, %s1957_s2, %s1862_s24, %s1862_s24, %s1863_s26  }
  0x2e   : > { %p136_p12 = scmp.lt.s32.totalorder %s1859_s11, 3  ;;  %p2891_p1 = scmp.ge.s32.totalorder %s1859_s11, 1 }
  0x30   : > { %p137_p3 = pnand %p2891_p1, %p136_p12 }
  0x32   : > { %140 = sbr.rel (%p137_p3) target bundleno = 668 (0x29c), region = 24 }
  0x39   : > { %s1989_s27 = sand.u32 1, %s1843_s7  }
  0x3a   : > { %s1659_s29 = smul.u32 384, %s1989_s27  ;;  %s143_s3 = scalar_lea.sflag [#allocation4], %s1989_s27 }
  0x3c   : > { %s1993_s4 = scalar_lea.vmem [#allocation3], %s1659_s29 }
  0x3d   : > { %1830 = dma.done.wait (%p1924_p8), %s143_s3, 6144  }
  0x3e   : > { %1832 = vsyncadd (%p1924_p8), %s143_s3, 4294961152  ;;  %v2000_v0 = vld [vmem:[%s1993_s4] sm:$0xff]  ;;  %v2003_v1 = vld [vmem:[%s1993_s4 + $0x10] sm:$0xff]  ;;  %s1864_s25 = smov 1   ;;  %vm307_vm0 = vcmask 130048   ;;  %vm502_vm1 = vcmask 1040384  }
  0x3f   : > { %993 = vrot.lane.b32.xlu0 %v2000_v0, %s1864_s25  ;;  %997 = vrot.lane.b32.xlu1 %v2003_v1, %s1864_s25  ;;  %v2010_v2 = vld [vmem:[%s1993_s4 + $0x8] sm:$0xff]  ;;  %v2013_v3 = vld [vmem:[%s1993_s4 + $0x18] sm:$0xff]  ;;  %v503_v42 = vrot.slane %v2000_v0, 7  ;;  %v506_v46 = vrot.slane %v2003_v1, 7  ;;  %vm767_vm2 = vcmask 1046528   ;;  %vm889_vm3 = vcmask 129024  }
  0x40   : > { %v2020_v4 = vld [vmem:[%s1993_s4 + $0x78] sm:$0xff]  ;;  %v2023_v5 = vld [vmem:[%s1993_s4 + $0x20] sm:$0xff]  ;;  %v2026_v6 = vld [vmem:[%s1993_s4 + $0x28] sm:$0xff]  ;;  %v504_v43 = vrot.slane %v2010_v2, 7  ;;  %v507_v47 = vrot.slane %v2013_v3, 7  ;;  %s1865_s18 = smov 127  }
  0x41   : > { %v2029_v7 = vld [vmem:[%s1993_s4 + $0x70] sm:$0xff]  ;;  %v2039_v9 = vld [vmem:[%s1993_s4 + $0x38] sm:$0xff]  ;;  %v2049_v11 = vld [vmem:[%s1993_s4 + $0x40] sm:$0xff]  ;;  %v623_v48 = vsub.f32 %v2000_v0, %v503_v42  ;;  %v625_v53 = vsub.f32 %v2003_v1, %v506_v46  ;;  %v509_v55 = vrot.slane %v2023_v5, 7  ;;  %v510_v56 = vrot.slane %v2026_v6, 7  ;;  %s1650_s28 = sshll.u32 %s1989_s27, 3 }
  0x42   : > { %v2036_v8 = vld [vmem:[%s1993_s4 + $0x30] sm:$0xff]  ;;  %v2042_v10 = vld [vmem:[%s1993_s4 + $0xf8] sm:$0xff]  ;;  %v2052_v12 = vld [vmem:[%s1993_s4 + $0x48] sm:$0xff]  ;;  %v505_v45 = vsel %vm502_vm1, %v503_v42, %v504_v43  ;;  %v508_v50 = vsel %vm502_vm1, %v506_v46, %v507_v47  ;;  %v513_v47 = vrot.slane %v2039_v9, 7  ;;  %vm1425_vm4 = vcmask 121856   ;;  %s1652_s12 = sshll.u32 %s1851_s9, 7 }
  0x43   : > { %995 = vrot.lane.b32.xlu0 %v2010_v2, %s1864_s25  ;;  %999 = vrot.lane.b32.xlu1 %v2013_v3, %s1864_s25  ;;  %v2055_v13 = vld [vmem:[%s1993_s4 + $0xf0] sm:$0xff]  ;;  %v2062_v14 = vld [vmem:[%s1993_s4 + $0x58] sm:$0xff]  ;;  %v624_v49 = vsub.f32 %v2010_v2, %v505_v45  ;;  %v671_v51 = vand.u32 2147483647, %v623_v48  ;;  %v626_v54 = vsub.f32 %v2013_v3, %v508_v50  ;;  %v673_v59 = vand.u32 2147483647, %v625_v53  ;;  %s2826_s22 = scalar_lea.hbm %s2876_s1, %s1652_s12 }
  0x44   : > { %v2065_v15 = vld [vmem:[%s1993_s4 + $0x50] sm:$0xff]  ;;  %v2071_v17 = vld [vmem:[%s1993_s4 + $0x178] sm:$0xff]  ;;  %v2078_v18 = vld [vmem:[%s1993_s4 + $0x68] sm:$0xff]  ;;  %v511_v61 = vsel %vm502_vm1, %v509_v55, %v510_v56  ;;  %v627_v62 = vsub.f32 %v2023_v5, %v509_v55  ;;  %v512_v46 = vrot.slane %v2036_v8, 7  ;;  %v223_v55 = vsub.f32 %v2003_v1, %v2000_v0  ;;  %s164_s13 = scalar_lea.vmem [#allocation6], %s1650_s28  ;;  %s1541_s23 = scalar_lea.sflag [#allocation5], %s1989_s27 }
  0x45   : > { %v2068_v16 = vld [vmem:[%s1993_s4 + $0x170] sm:$0xff]  ;;  %v2081_v19 = vld [vmem:[%s1993_s4 + $0x60] sm:$0xff]  ;;  %v2092_v20 = vld [vmem:[%s1993_s4 + $0x88] sm:$0xff]  ;;  %v672_v52 = vand.u32 2147483647, %v624_v49  ;;  %v768_v57 = vrot.slane %v671_v51, 1  ;;  %v628_v45 = vsub.f32 %v2026_v6, %v511_v61 }
  0x46   : > { %2892 = vst [vmem:[#allocation9_spill] sm:$0xff] %v2068_v16  ;;  %v2095_v21 = vld [vmem:[%s1993_s4 + $0x80] sm:$0xff]  ;;  %v2102_v22 = vld [vmem:[%s1993_s4 + $0x98] sm:$0xff]  ;;  %v2105_v23 = vld [vmem:[%s1993_s4 + $0x90] sm:$0xff]  ;;  %v674_v60 = vand.u32 2147483647, %v626_v54  ;;  %v514_v53 = vsel %vm502_vm1, %v512_v46, %v513_v47 }
  0x47   : > { %1001 = vrot.lane.b32.xlu0 %v2023_v5, %s1864_s25  ;;  %1003 = vrot.lane.b32.xlu1 %v2026_v6, %s1864_s25  ;;  %v2112_v24 = vld [vmem:[%s1993_s4 + $0xa8] sm:$0xff]  ;;  %v2115_v25 = vld [vmem:[%s1993_s4 + $0xa0] sm:$0xff]  ;;  %v769_v58 = vrot.slane %v672_v52, 1  ;;  %v771_v42 = vrot.slane %v673_v59, 1  ;;  %v675_v51 = vand.u32 2147483647, %v627_v62  ;;  %v224_v59 = vsub.f32 %v2013_v3, %v2010_v2 }
  0x48   : > { %v2122_v26 = vld [vmem:[%s1993_s4 + $0xb8] sm:$0xff]  ;;  %v2125_v27 = vld [vmem:[%s1993_s4 + $0xb0] sm:$0xff]  ;;  %v2132_v28 = vld [vmem:[%s1993_s4 + $0xc8] sm:$0xff]  ;;  %v772_v43 = vrot.slane %v674_v60, 1  ;;  %v676_v52 = vand.u32 2147483647, %v628_v45  ;;  %v629_v62 = vsub.f32 %v2036_v8, %v512_v46 }
  0x49   : > { %v2135_v29 = vld [vmem:[%s1993_s4 + $0xc0] sm:$0xff]  ;;  %v2142_v30 = vld [vmem:[%s1993_s4 + $0xd8] sm:$0xff]  ;;  %v2145_v31 = vld [vmem:[%s1993_s4 + $0xd0] sm:$0xff]  ;;  %v770_v63 = vsel %vm767_vm2, %v768_v57, %v769_v58  ;;  %v890_v49 = vsel %vm889_vm3, %v769_v58, 0.0  ;;  %v774_v58 = vrot.slane %v675_v51, 1  ;;  %v515_v45 = vrot.slane %v2049_v11, 7 }
  0x4a   : > { %v2152_v32 = vld [vmem:[%s1993_s4 + $0xe8] sm:$0xff]  ;;  %v2155_v33 = vld [vmem:[%s1993_s4 + $0xe0] sm:$0xff]  ;;  %v2176_v36 = vld [vmem:[%s1993_s4 + $0x110] sm:$0xff]  ;;  %v888_v48 = vsel %vm307_vm0, %v770_v63, 0.0  ;;  %v773_v50 = vsel %vm767_vm2, %v771_v42, %v772_v43  ;;  %v775_v63 = vrot.slane %v676_v52, 1  ;;  %v630_v42 = vsub.f32 %v2039_v9, %v514_v53  ;;  %s1556_s15 = sshll.u32 %s164_s13, 4  ;;  %s2828_s15 = int_to_ptr.vmem [resolvable:$true] %s1556_s15 }
  0x4b   : > { %1005 = vrot.lane.b32.xlu0 %v2036_v8, %s1864_s25  ;;  %1007 = vrot.lane.b32.xlu1 %v2039_v9, %s1864_s25  ;;  %v2166_v34 = vld [vmem:[%s1993_s4 + $0x108] sm:$0xff]  ;;  %v2169_v35 = vld [vmem:[%s1993_s4 + $0x100] sm:$0xff]  ;;  %v891_v54 = vadd.f32 %v890_v49, %v888_v48  ;;  %v892_v60 = vsel %vm307_vm0, %v773_v50, 0.0  ;;  %v516_v47 = vrot.slane %v2052_v12, 7  ;;  %v265_v49 = vand.u32 2147483647, %v223_v55 }
  0x4c   : > { %v2181_v37 = vld [vmem:[%s1993_s4 + $0x118] sm:$0xff]  ;;  %v2186_v38 = vld [vmem:[%s1993_s4 + $0x120] sm:$0xff]  ;;  %v2191_v39 = vld [vmem:[%s1993_s4 + $0x128] sm:$0xff]  ;;  %v894_v51 = vsel %vm889_vm3, %v772_v43, 0.0  ;;  %v776_v53 = vsel %vm767_vm2, %v774_v58, %v775_v63  ;;  %v2249_v55 = vand.u32 2147483647, %v630_v42 }
  0x4d   : > { %2893 = vst [vmem:[#allocation10_spill] sm:$0xff] %v2186_v38  ;;  %v2196_v40 = vld [vmem:[%s1993_s4 + $0x130] sm:$0xff]  ;;  %v2201_v41 = vld [vmem:[%s1993_s4 + $0x138] sm:$0xff]  ;;  %v2208_v44 = vld [vmem:[%s1993_s4 + $0x140] sm:$0xff]  ;;  %v308_v43 = vsel %vm307_vm0, %v265_v49, 0.0  ;;  %s1777_s24 = scalar_lea.vmem %s2828_s15, 128 }
  0x4e   : > { %2894 = vst [vmem:[#allocation11_spill] sm:$0xff] %v2196_v40  ;;  %2895 = vst [vmem:[#allocation12_spill] sm:$0xff] %v2208_v44  ;;  %v2268_v49 = vld [vmem:[%s1993_s4 + $0x150] sm:$0xff]  ;;  %p1778_p8 = scmp.ne.s32.totalorder %s2828_s15, %s1777_s24  ;;  %p2906_p9 = scmp.ne.s32.totalorder %s2888_s19, 0 }
  0x4f   : > { %1009 = vrot.lane.b32.xlu0 %v2049_v11, %s1864_s25  ;;  %1011 = vrot.lane.b32.xlu1 %v2052_v12, %s1864_s25  ;;  %2896 = vst [vmem:[#allocation13_spill] sm:$0xff] %v2268_v49  ;;  %s1866_s9 = smov [#allocation6]  }
  0x50   : > { %p1779_p11 = pnand %p1778_p8, %p2906_p9  ;;  %s1781_s26 = sshll.u32 %s1866_s9, 4  ;;  %s1782_s26 = int_to_ptr.vmem [resolvable:$false] %s1781_s26 }
  0x51   : > { %s1783_s29 = scalar_lea.vmem %s1782_s26, 256  ;;  %p1784_p5 = scmp.lt.s32.totalorder %s2828_s15, %s1782_s26 }
  0x52   : > { %p1780_p0 = pneg %p1779_p11  ;;  %p1785_p13 = scmp.lt.s32.totalorder %s1783_s29, %s1777_s24 }
  0x53   : > { %1015 = vrot.lane.b32.xlu1 %v2062_v14, %s1864_s25  ;;  %1013 = vrot.lane.b32.xlu0 %v2065_v15, %s1864_s25 }
  0x54   : > { %p1786_p2 = por %p1785_p13, %p1784_p5 }
  0x56   : > { %p1787_p4 = pnand %p1786_p2, %p1780_p0 }
  0x57   : > { %1019 = vrot.lane.b32.xlu1 %v2078_v18, %s1864_s25  ;;  %1017 = vrot.lane.b32.xlu0 %v2081_v19, %s1864_s25 }
  0x5b   : > { %1023 = vrot.lane.b32.xlu1 %v2020_v4, %s1864_s25  ;;  %1021 = vrot.lane.b32.xlu0 %v2029_v7, %s1864_s25 }
  0x5f   : > { %1027 = vrot.lane.b32.xlu1 %v2092_v20, %s1864_s25  ;;  %1025 = vrot.lane.b32.xlu0 %v2095_v21, %s1864_s25 }
  0x63   : > { %1031 = vrot.lane.b32.xlu1 %v2102_v22, %s1864_s25  ;;  %1029 = vrot.lane.b32.xlu0 %v2105_v23, %s1864_s25 }
  0x67   : > { %1035 = vrot.lane.b32.xlu1 %v2112_v24, %s1864_s25  ;;  %1033 = vrot.lane.b32.xlu0 %v2115_v25, %s1864_s25 }
  0x6b   : > { %1039 = vrot.lane.b32.xlu1 %v2122_v26, %s1864_s25  ;;  %1037 = vrot.lane.b32.xlu0 %v2125_v27, %s1864_s25 }
  0x6f   : > { %1043 = vrot.lane.b32.xlu1 %v2132_v28, %s1864_s25  ;;  %1041 = vrot.lane.b32.xlu0 %v2135_v29, %s1864_s25 }
  0x73   : > { %1047 = vrot.lane.b32.xlu1 %v2142_v30, %s1864_s25  ;;  %1045 = vrot.lane.b32.xlu0 %v2145_v31, %s1864_s25 }
  0x77   : > { %1051 = vrot.lane.b32.xlu1 %v2152_v32, %s1864_s25  ;;  %1049 = vrot.lane.b32.xlu0 %v2155_v33, %s1864_s25 }
  0x7b   : > { %1055 = vrot.lane.b32.xlu1 %v2042_v10, %s1864_s25  ;;  %1053 = vrot.lane.b32.xlu0 %v2055_v13, %s1864_s25 }
  0x7f   : > { %1059 = vrot.lane.b32.xlu1 %v2166_v34, %s1864_s25  ;;  %1057 = vrot.lane.b32.xlu0 %v2169_v35, %s1864_s25 }
  0x83   : > { %1061 = vrot.lane.b32.xlu1 %v2176_v36, %s1864_s25 }
  0x87   : > { %1063 = vrot.lane.b32.xlu1 %v2181_v37, %s1864_s25 }
  0x8b   : > { %1065 = vrot.lane.b32.xlu1 %v2186_v38, %s1864_s25 }
  0x8f   : > { %1067 = vrot.lane.b32.xlu1 %v2191_v39, %s1864_s25 }
  0x93   : > { %1069 = vrot.lane.b32.xlu1 %v2196_v40, %s1864_s25  ;;  %v225_v40 = vsub.f32 %v2023_v5, %v2003_v1 }
  0x97   : > { %1071 = vrot.lane.b32.xlu1 %v2201_v41, %s1864_s25 }
  0x9b   : > { %1073 = vrot.lane.b32.xlu1 %v2208_v44, %s1864_s25  ;;  %v893_v44 = vadd.f32 %v892_v60, %v891_v54  ;;  %v2252_v54 = vld [vmem:[%s1993_s4 + $0x148] sm:$0xff]  ;;  %v517_v60 = vsel %vm502_vm1, %v515_v45, %v516_v47 }
  0x9c   : > { %v632_v47 = vsub.f32 %v2052_v12, %v517_v60 }
  0xb1   : > { %v994_v56 = vpop.permute.xlu0 %993  ;;  %v998_v57 = vpop.permute.xlu1 %997 }
  0xb2   : > { %v1137_v61 = vsub.f32 %v2000_v0, %v994_v56  ;;  %v266_v0 = vand.u32 2147483647, %v224_v59  ;;  %v1139_v52 = vsub.f32 %v2003_v1, %v998_v57  ;;  %v677_v56 = vand.u32 2147483647, %v629_v62 }
  0xb3   : > { %v895_v59 = vadd.f32 %v894_v51, %v893_v44  ;;  %v896_v57 = vsel %vm307_vm0, %v776_v53, 0.0  ;;  %v778_v44 = vrot.slane %v2249_v55, 1  ;;  %v519_v51 = vrot.slane %v2062_v14, 7 }
  0xb4   : > { %v1185_v48 = vand.u32 2147483647, %v1137_v61  ;;  %v309_v1 = vsel %vm307_vm0, %v266_v0, 0.0  ;;  %v1187_v58 = vand.u32 2147483647, %v1139_v52  ;;  %v777_v42 = vrot.slane %v677_v56, 1 }
  0xb5   : > { %v996_v50 = vpop.permute.xlu0 %995  ;;  %v1000_v38 = vpop.permute.xlu1 %999  ;;  %v310_v52 = vadd.f32 %v309_v1, %v308_v43  ;;  %v898_v56 = vsel %vm889_vm3, %v775_v63, 0.0 }
  0xb6   : > { %v1138_v46 = vsub.f32 %v2010_v2, %v996_v50  ;;  %1281 = vrot.lane.b32.xlu1 %v1185_v48, %s1865_s18  ;;  %v267_v2 = vand.u32 2147483647, %v225_v40  ;;  %v226_v48 = vsub.f32 %v2026_v6, %v2013_v3  ;;  %v1140_v62 = vsub.f32 %v2013_v3, %v1000_v38 }
  0xb7   : > { %v631_v40 = vsub.f32 %v2049_v11, %v515_v45  ;;  %v897_v3 = vadd.f32 %v896_v57, %v895_v59  ;;  %v227_v45 = vsub.f32 %v2036_v8, %v2023_v5  ;;  %v779_v43 = vsel %vm767_vm2, %v777_v42, %v778_v44  ;;  %v2286_v59 = vld [vmem:[%s1993_s4 + $0x158] sm:$0xff] }
  0xb8   : > { %v1186_v61 = vand.u32 2147483647, %v1138_v46  ;;  %v518_v46 = vrot.slane %v2065_v15, 7  ;;  %v311_v53 = vsel %vm307_vm0, %v267_v2, 0.0  ;;  %v1188_v55 = vand.u32 2147483647, %v1140_v62 }
  0xb9   : > { %v1004_v50 = vpop.permute.xlu1 %1003  ;;  %v1002_v0 = vpop.permute.xlu0 %1001  ;;  %v679_v2 = vand.u32 2147483647, %v631_v40  ;;  %2897 = vst [vmem:[#allocation14_spill] sm:$0xff] %v2286_v59  ;;  %v312_v1 = vadd.f32 %v311_v53, %v310_v52  ;;  %v899_v62 = vadd.f32 %v898_v56, %v897_v3  ;;  %v900_v42 = vsel %vm307_vm0, %v779_v43, 0.0 }
  0xba   : > { %1075 = vrot.lane.b32.xlu1 %v2252_v54, %s1864_s25  ;;  %1283 = vrot.lane.b32.xlu0 %v1186_v61, %s1865_s18  ;;  %v268_v61 = vand.u32 2147483647, %v226_v48  ;;  %v1141_v60 = vsub.f32 %v2023_v5, %v1002_v0  ;;  %v2283_v48 = vand.u32 2147483647, %v632_v47  ;;  %v520_v63 = vsel %vm502_vm1, %v518_v46, %v519_v51 }
  0xbb   : > { %v269_v5 = vand.u32 2147483647, %v227_v45  ;;  %v1142_v47 = vsub.f32 %v2026_v6, %v1004_v50  ;;  %v780_v0 = vrot.slane %v679_v2, 1  ;;  %v633_v52 = vsub.f32 %v2065_v15, %v518_v46 }
  0xbc   : > { %v313_v57 = vsel %vm307_vm0, %v268_v61, 0.0  ;;  %v1189_v40 = vand.u32 2147483647, %v1141_v60  ;;  %v781_v51 = vrot.slane %v2283_v48, 1  ;;  %v634_v53 = vsub.f32 %v2062_v14, %v520_v63  ;;  %v2303_v61 = vld [vmem:[%s1993_s4 + $0x160] sm:$0xff] }
  0xbd   : > { %v2273_v38 = vpop.permute.xlu1 %1007  ;;  %2898 = vst [vmem:[#allocation15_spill] sm:$0xff] %v2303_v61  ;;  %v1006_v3 = vpop.permute.xlu0 %1005  ;;  %v522_v56 = vrot.slane %v2078_v18, 7  ;;  %v521_v45 = vrot.slane %v2081_v19, 7  ;;  %v314_v60 = vadd.f32 %v313_v57, %v312_v1  ;;  %v315_v46 = vsel %vm307_vm0, %v269_v5, 0.0 }
  0xbe   : > { %1077 = vrot.lane.b32.xlu1 %v2268_v49, %s1864_s25  ;;  %1285 = vrot.lane.b32.xlu0 %v1187_v58, %s1865_s18  ;;  %v228_v49 = vsub.f32 %v2039_v9, %v2026_v6  ;;  %v229_v6 = vsub.f32 %v2049_v11, %v2036_v8  ;;  %v902_v2 = vsel %vm889_vm3, %v778_v44, 0.0  ;;  %v1190_v48 = vand.u32 2147483647, %v1142_v47 }
  0xbf   : > { %v1143_v63 = vsub.f32 %v2036_v8, %v1006_v3  ;;  %v681_v1 = vand.u32 2147483647, %v633_v52  ;;  %v2318_v57 = vand.u32 2147483647, %v634_v53  ;;  %v316_v5 = vadd.f32 %v315_v46, %v314_v60 }
  0xc0   : > { %v270_v43 = vand.u32 2147483647, %v228_v49  ;;  %v782_v49 = vsel %vm767_vm2, %v780_v0, %v781_v51  ;;  %v1144_v52 = vsub.f32 %v2039_v9, %v2273_v38  ;;  %v906_v38 = vsel %vm889_vm3, %v781_v51, 0.0 }
  0xc1   : > { %v2292_v58 = vpop.permute.xlu1 %1011  ;;  %v904_v8 = vsel %vm307_vm0, %v782_v49, 0.0  ;;  %v1191_v0 = vand.u32 2147483647, %v1143_v63  ;;  %v783_v53 = vrot.slane %v681_v1, 1  ;;  %v784_v3 = vrot.slane %v2318_v57, 1 }
  0xc2   : > { %1079 = vrot.lane.b32.xlu1 %v2286_v59, %s1864_s25  ;;  %1287 = vrot.lane.b32.xlu0 %v1188_v55, %s1865_s18  ;;  %v901_v55 = vadd.f32 %v900_v42, %v899_v62  ;;  %v2321_v62 = vld [vmem:[%s1993_s4 + $0x168] sm:$0xff]  ;;  %v523_v42 = vsel %vm502_vm1, %v521_v45, %v522_v56  ;;  %v317_v44 = vsel %vm307_vm0, %v270_v43, 0.0  ;;  %v635_v56 = vsub.f32 %v2081_v19, %v521_v45  ;;  %v1010_v43 = vpop.permute.xlu0 %1009 }
  0xc3   : > { %v636_v60 = vsub.f32 %v2078_v18, %v523_v42  ;;  %v318_v46 = vadd.f32 %v317_v44, %v316_v5  ;;  %v1192_v45 = vand.u32 2147483647, %v1144_v52  ;;  %v1145_v1 = vsub.f32 %v2049_v11, %v1010_v43 }
  0xc4   : > { %v903_v47 = vadd.f32 %v902_v2, %v901_v55  ;;  %v525_v55 = vrot.slane %v2020_v4, 7  ;;  %v683_v57 = vand.u32 2147483647, %v635_v56  ;;  %v232_v44 = vsub.f32 %v2062_v14, %v2052_v12 }
  0xc5   : > { %v2309_v50 = vpop.permute.xlu1 %1015  ;;  %v2351_v42 = vand.u32 2147483647, %v636_v60 }
  0xc6   : > { %1081 = vrot.lane.b32.xlu1 %v2303_v61, %s1864_s25  ;;  %1289 = vrot.lane.b32.xlu0 %v1189_v40, %s1865_s18  ;;  %v230_v61 = vsub.f32 %v2052_v12, %v2039_v9  ;;  %v271_v40 = vand.u32 2147483647, %v229_v6  ;;  %v524_v6 = vrot.slane %v2029_v7, 7  ;;  %v905_v63 = vadd.f32 %v904_v8, %v903_v47  ;;  %v1014_v5 = vpop.permute.xlu0 %1013 }
  0xc7   : > { %v786_v60 = vrot.slane %v683_v57, 1  ;;  %v787_v43 = vrot.slane %v2351_v42, 1  ;;  %v1147_v57 = vsub.f32 %v2065_v15, %v1014_v5 }
  0xc8   : > { %v272_v2 = vand.u32 2147483647, %v230_v61  ;;  %v319_v9 = vsel %vm307_vm0, %v271_v40, 0.0  ;;  %v785_v61 = vsel %vm767_vm2, %v783_v53, %v784_v3  ;;  %v526_v47 = vsel %vm502_vm1, %v524_v6, %v525_v55 }
  0xc9   : > { %v2327_v59 = vpop.permute.xlu1 %1019  ;;  %v320_v51 = vadd.f32 %v319_v9, %v318_v46  ;;  %v907_v8 = vadd.f32 %v906_v38, %v905_v63  ;;  %v1146_v53 = vsub.f32 %v2052_v12, %v2292_v58  ;;  %v637_v55 = vsub.f32 %v2029_v7, %v524_v6 }
  0xca   : > { %1083 = vrot.lane.b32.xlu1 %v2321_v62, %s1864_s25  ;;  %1291 = vrot.lane.b32.xlu0 %v1190_v48, %s1865_s18  ;;  %v231_v48 = vsub.f32 %v2065_v15, %v2049_v11  ;;  %v321_v40 = vsel %vm307_vm0, %v272_v2, 0.0  ;;  %v1193_v11 = vand.u32 2147483647, %v1145_v1  ;;  %v638_v46 = vsub.f32 %v2020_v4, %v526_v47  ;;  %v2367_v2 = vpop.permute.xlu0 %1017 }
  0xcb   : > { %v274_v63 = vand.u32 2147483647, %v232_v44  ;;  %v527_v9 = vrot.slane %v2095_v21, 7  ;;  %v910_v6 = vsel %vm889_vm3, %v784_v3, 0.0  ;;  %v788_v44 = vsel %vm767_vm2, %v786_v60, %v787_v43 }
  0xcc   : > { %v273_v52 = vand.u32 2147483647, %v231_v48  ;;  %v528_v48 = vrot.slane %v2092_v20, 7  ;;  %v685_v47 = vand.u32 2147483647, %v637_v55  ;;  %v234_v3 = vsub.f32 %v2078_v18, %v2062_v14 }
  0xcd   : > { %v2342_v49 = vpop.permute.xlu1 %1023  ;;  %v912_v60 = vsel %vm307_vm0, %v788_v44, 0.0  ;;  %v1148_v55 = vsub.f32 %v2062_v14, %v2309_v50  ;;  %v530_v14 = vrot.slane %v2105_v23, 7 }
  0xce   : > { %1085 = vrot.lane.b32.xlu1 %v2068_v16, %s1864_s25  ;;  %1293 = vrot.lane.b32.xlu0 %v1191_v0, %s1865_s18  ;;  %v908_v0 = vsel %vm307_vm0, %v785_v61, 0.0  ;;  %v323_v12 = vsel %vm307_vm0, %v273_v52, 0.0  ;;  %v1194_v61 = vand.u32 2147483647, %v1146_v53  ;;  %v529_v52 = vsel %vm502_vm1, %v527_v9, %v528_v48 }
  0xcf   : > { %v909_v58 = vadd.f32 %v908_v0, %v907_v8  ;;  %v325_v8 = vsel %vm307_vm0, %v274_v63, 0.0  ;;  %v789_v48 = vrot.slane %v685_v47, 1  ;;  %v1196_v47 = vand.u32 2147483647, %v1148_v55 }
  0xd1   : > { %v1028_v16 = vpop.permute.xlu1 %1027  ;;  %v911_v5 = vadd.f32 %v910_v6, %v909_v58 }
  0xd2   : > { %1087 = vrot.lane.b32.xlu1 %v2071_v17, %s1864_s25  ;;  %1295 = vrot.lane.b32.xlu0 %v1192_v45, %s1865_s18  ;;  %v1154_v56 = vsub.f32 %v2092_v20, %v1028_v16  ;;  %v322_v45 = vadd.f32 %v321_v40, %v320_v51  ;;  %v233_v16 = vsub.f32 %v2081_v19, %v2065_v15  ;;  %v2380_v51 = vand.u32 2147483647, %v638_v46  ;;  %v2382_v40 = vpop.permute.xlu0 %1021 }
  0xd3   : > { %v1195_v46 = vand.u32 2147483647, %v1147_v57  ;;  %v913_v57 = vadd.f32 %v912_v60, %v911_v5 }
  0xd4   : > { %v1202_v38 = vand.u32 2147483647, %v1154_v56  ;;  %v324_v15 = vadd.f32 %v323_v12, %v322_v45  ;;  %v275_v53 = vand.u32 2147483647, %v233_v16  ;;  %v639_v45 = vsub.f32 %v2095_v21, %v527_v9 }
  0xd5   : > { %v1032_v1 = vpop.permute.xlu1 %1031  ;;  %v640_v12 = vsub.f32 %v2092_v20, %v529_v52  ;;  %v276_v16 = vand.u32 2147483647, %v234_v3  ;;  %v914_v9 = vsel %vm889_vm3, %v787_v43, 0.0 }
  0xd6   : > { %1297 = vrot.lane.b32.xlu0 %v1193_v11, %s1865_s18  ;;  %v1156_v42 = vsub.f32 %v2102_v22, %v1032_v1  ;;  %1315 = vrot.lane.b32.xlu1 %v1202_v38, %s1865_s18  ;;  %v236_v11 = vsub.f32 %v2020_v4, %v2078_v18  ;;  %v790_v38 = vrot.slane %v2380_v51, 1  ;;  %v2399_v58 = vpop.permute.xlu0 %1025  ;;  %v531_v1 = vrot.slane %v2102_v22, 7 }
  0xd7   : > { %v327_v6 = vsel %vm307_vm0, %v275_v53, 0.0  ;;  %v1149_v51 = vsub.f32 %v2081_v19, %v2367_v2  ;;  %v915_v60 = vadd.f32 %v914_v9, %v913_v57  ;;  %v238_v57 = vsub.f32 %v2102_v22, %v2092_v20 }
  0xd8   : > { %v1204_v0 = vand.u32 2147483647, %v1156_v42  ;;  %v235_v42 = vsub.f32 %v2029_v7, %v2081_v19  ;;  %v791_v52 = vsel %vm767_vm2, %v789_v48, %v790_v38  ;;  %v278_v53 = vand.u32 2147483647, %v236_v11 }
  0xd9   : > { %v1036_v56 = vpop.permute.xlu1 %1035  ;;  %v329_v19 = vsel %vm307_vm0, %v276_v16, 0.0  ;;  %v916_v2 = vsel %vm307_vm0, %v791_v52, 0.0  ;;  %v533_v16 = vrot.slane %v2115_v25, 7 }
  0xda   : > { %1299 = vrot.lane.b32.xlu0 %v1194_v61, %s1865_s18  ;;  %v1158_v63 = vsub.f32 %v2112_v24, %v1036_v56  ;;  %1319 = vrot.lane.b32.xlu1 %v1204_v0, %s1865_s18  ;;  %v326_v61 = vadd.f32 %v325_v8, %v324_v15  ;;  %v687_v8 = vand.u32 2147483647, %v639_v45  ;;  %v2413_v0 = vand.u32 2147483647, %v640_v12 }
  0xdb   : > { %v532_v15 = vsel %vm502_vm1, %v530_v14, %v531_v1  ;;  %v277_v56 = vand.u32 2147483647, %v235_v42  ;;  %v641_v12 = vsub.f32 %v2105_v23, %v530_v14  ;;  %v917_v9 = vadd.f32 %v916_v2, %v915_v60 }
  0xdc   : > { %v1206_v50 = vand.u32 2147483647, %v1158_v63  ;;  %v328_v43 = vadd.f32 %v327_v6, %v326_v61  ;;  %v1197_v63 = vand.u32 2147483647, %v1149_v51  ;;  %v792_v45 = vrot.slane %v687_v8, 1 }
  0xdd   : > { %v1040_v44 = vpop.permute.xlu1 %1039  ;;  %v793_v11 = vrot.slane %v2413_v0, 1  ;;  %v642_v1 = vsub.f32 %v2102_v22, %v532_v15  ;;  %v1150_v6 = vsub.f32 %v2078_v18, %v2327_v59  ;;  %v331_v42 = vsel %vm307_vm0, %v277_v56, 0.0 }
  0xde   : > { %1301 = vrot.lane.b32.xlu0 %v1195_v46, %s1865_s18  ;;  %v1160_v3 = vsub.f32 %v2122_v26, %v1040_v44  ;;  %1323 = vrot.lane.b32.xlu1 %v1206_v50, %s1865_s18  ;;  %v2416_v46 = vpop.permute.xlu0 %1029  ;;  %v534_v50 = vrot.slane %v2112_v24, 7  ;;  %v330_v44 = vadd.f32 %v329_v19, %v328_v43  ;;  %v918_v14 = vsel %vm889_vm3, %v790_v38, 0.0 }
  0xdf   : > { %v237_v51 = vsub.f32 %v2105_v23, %v2095_v21  ;;  %v794_v20 = vsel %vm767_vm2, %v792_v45, %v793_v11  ;;  %v689_v59 = vand.u32 2147483647, %v641_v12  ;;  %v2442_v52 = vand.u32 2147483647, %v642_v1 }
  0xe0   : > { %v1208_v5 = vand.u32 2147483647, %v1160_v3  ;;  %v1151_v3 = vsub.f32 %v2029_v7, %v2382_v40  ;;  %v535_v38 = vsel %vm502_vm1, %v533_v16, %v534_v50  ;;  %v1198_v0 = vand.u32 2147483647, %v1150_v6 }
  0xe1   : > { %v1044_v55 = vpop.permute.xlu1 %1043  ;;  %v280_v43 = vand.u32 2147483647, %v238_v57  ;;  %v332_v56 = vadd.f32 %v331_v42, %v330_v44  ;;  %v919_v7 = vadd.f32 %v918_v14, %v917_v9  ;;  %v920_v60 = vsel %vm307_vm0, %v794_v20, 0.0 }
  0xe2   : > { %1303 = vrot.lane.b32.xlu0 %v1196_v47, %s1865_s18  ;;  %v1162_v48 = vsub.f32 %v2132_v28, %v1044_v55  ;;  %1327 = vrot.lane.b32.xlu1 %v1208_v5, %s1865_s18  ;;  %v2444_v8 = vpop.permute.xlu0 %1033  ;;  %v333_v5 = vsel %vm307_vm0, %v278_v53, 0.0  ;;  %v279_v55 = vand.u32 2147483647, %v237_v51  ;;  %v1199_v19 = vand.u32 2147483647, %v1151_v3 }
  0xe3   : > { %v643_v45 = vsub.f32 %v2115_v25, %v533_v16  ;;  %v644_v53 = vsub.f32 %v2112_v24, %v535_v38  ;;  %v537_v12 = vrot.slane %v2122_v26, 7  ;;  %v536_v1 = vrot.slane %v2125_v27, 7 }
  0xe4   : > { %v1210_v61 = vand.u32 2147483647, %v1162_v48  ;;  %v796_v48 = vrot.slane %v2442_v52, 1  ;;  %v1152_v50 = vsub.f32 %v2020_v4, %v2342_v49  ;;  %v334_v57 = vadd.f32 %v333_v5, %v332_v56 }
  0xe5   : > { %v1048_v47 = vpop.permute.xlu1 %1047  ;;  %v239_v42 = vsub.f32 %v2115_v25, %v2105_v23  ;;  %v922_v16 = vsel %vm889_vm3, %v793_v11, 0.0  ;;  %v1153_v14 = vsub.f32 %v2095_v21, %v2399_v58  ;;  %v691_v51 = vand.u32 2147483647, %v643_v45 }
  0xe6   : > { %1305 = vrot.lane.b32.xlu0 %v1197_v63, %s1865_s18  ;;  %v1164_v18 = vsub.f32 %v2142_v30, %v1048_v47  ;;  %1331 = vrot.lane.b32.xlu1 %v1210_v61, %s1865_s18  ;;  %v795_v63 = vrot.slane %v689_v59, 1  ;;  %v921_v61 = vadd.f32 %v920_v60, %v919_v7  ;;  %v2461_v44 = vpop.permute.xlu0 %1037  ;;  %v335_v47 = vsel %vm307_vm0, %v279_v55, 0.0 }
  0xe7   : > { %v2471_v3 = vand.u32 2147483647, %v644_v53  ;;  %v538_v11 = vsel %vm502_vm1, %v536_v1, %v537_v12  ;;  %v1200_v20 = vand.u32 2147483647, %v1152_v50  ;;  %v240_v52 = vsub.f32 %v2112_v24, %v2102_v22 }
  0xe8   : > { %v1212_v15 = vand.u32 2147483647, %v1164_v18  ;;  %v797_v49 = vsel %vm767_vm2, %v795_v63, %v796_v48  ;;  %v337_v18 = vsel %vm307_vm0, %v280_v43, 0.0  ;;  %v923_v38 = vadd.f32 %v922_v16, %v921_v61 }
  0xe9   : > { %v1052_v40 = vpop.permute.xlu1 %1051  ;;  %v336_v21 = vadd.f32 %v335_v47, %v334_v57  ;;  %v281_v58 = vand.u32 2147483647, %v239_v42  ;;  %v1201_v5 = vand.u32 2147483647, %v1153_v14  ;;  %v1155_v56 = vsub.f32 %v2105_v23, %v2416_v46 }
  0xea   : > { %1307 = vrot.lane.b32.xlu0 %v1198_v0, %s1865_s18  ;;  %v1166_v2 = vsub.f32 %v2152_v32, %v1052_v40  ;;  %1335 = vrot.lane.b32.xlu1 %v1212_v15, %s1865_s18  ;;  %v924_v15 = vsel %vm307_vm0, %v797_v49, 0.0  ;;  %v798_v7 = vrot.slane %v691_v51, 1  ;;  %v799_v40 = vrot.slane %v2471_v3, 1  ;;  %v1042_v55 = vpop.permute.xlu0 %1041 }
  0xeb   : > { %v645_v22 = vsub.f32 %v2125_v27, %v536_v1  ;;  %v646_v60 = vsub.f32 %v2122_v26, %v538_v11  ;;  %v282_v45 = vand.u32 2147483647, %v240_v52  ;;  %v338_v53 = vadd.f32 %v337_v18, %v336_v21 }
  0xec   : > { %v1214_v6 = vand.u32 2147483647, %v1166_v2  ;;  %v539_v2 = vrot.slane %v2135_v29, 7  ;;  %v925_v23 = vadd.f32 %v924_v15, %v923_v38  ;;  %v241_v46 = vsub.f32 %v2125_v27, %v2115_v25 }
  0xed   : > { %v1056_v9 = vpop.permute.xlu1 %1055  ;;  %v926_v50 = vsel %vm889_vm3, %v796_v48, 0.0  ;;  %v339_v1 = vsel %vm307_vm0, %v281_v58, 0.0  ;;  %v1157_v61 = vsub.f32 %v2115_v25, %v2444_v8  ;;  %v800_v57 = vsel %vm767_vm2, %v798_v7, %v799_v40 }
  0xee   : > { %1309 = vrot.lane.b32.xlu0 %v1199_v19, %s1865_s18  ;;  %v1168_v4 = vsub.f32 %v2042_v10, %v1056_v9  ;;  %1339 = vrot.lane.b32.xlu1 %v1214_v6, %s1865_s18  ;;  %v540_v19 = vrot.slane %v2132_v28, 7  ;;  %v1203_v6 = vand.u32 2147483647, %v1155_v56  ;;  %v693_v42 = vand.u32 2147483647, %v645_v22  ;;  %v1046_v51 = vpop.permute.xlu0 %1045 }
  0xef   : > { %v694_v9 = vand.u32 2147483647, %v646_v60  ;;  %v242_v16 = vsub.f32 %v2122_v26, %v2112_v24  ;;  %v341_v48 = vsel %vm307_vm0, %v282_v45, 0.0  ;;  %v927_v14 = vadd.f32 %v926_v50, %v925_v23 }
  0xf0   : > { %v1216_v59 = vand.u32 2147483647, %v1168_v4  ;;  %v541_v47 = vsel %vm502_vm1, %v539_v2, %v540_v19  ;;  %v340_v4 = vadd.f32 %v339_v1, %v338_v53  ;;  %v283_v49 = vand.u32 2147483647, %v241_v46 }
  0xf1   : > { %v1060_v0 = vpop.permute.xlu1 %1059  ;;  %v928_v25 = vsel %vm307_vm0, %v800_v57, 0.0  ;;  %v1205_v8 = vand.u32 2147483647, %v1157_v61  ;;  %v1159_v18 = vsub.f32 %v2125_v27, %v2461_v44  ;;  %v801_v24 = vrot.slane %v693_v42, 1 }
  0xf2   : > { %1311 = vrot.lane.b32.xlu0 %v1200_v20, %s1865_s18  ;;  %v1170_v43 = vsub.f32 %v2166_v34, %v1060_v0  ;;  %1343 = vrot.lane.b32.xlu1 %v1216_v59, %s1865_s18  ;;  %v802_v20 = vrot.slane %v694_v9, 1  ;;  %v647_v59 = vsub.f32 %v2135_v29, %v539_v2  ;;  %v648_v52 = vsub.f32 %v2132_v28, %v541_v47  ;;  %v1050_v45 = vpop.permute.xlu0 %1049 }
  0xf3   : > { %v543_v38 = vrot.slane %v2142_v30, 7  ;;  %v542_v21 = vrot.slane %v2145_v31, 7  ;;  %v284_v0 = vand.u32 2147483647, %v242_v16  ;;  %v342_v15 = vadd.f32 %v341_v48, %v340_v4 }
  0xf4   : > { %v1218_v63 = vand.u32 2147483647, %v1170_v43  ;;  %v243_v56 = vsub.f32 %v2135_v29, %v2125_v27  ;;  %v930_v43 = vsel %vm889_vm3, %v799_v40, 0.0  ;;  %v343_v7 = vsel %vm307_vm0, %v283_v49, 0.0 }
  0xf5   : > { %v2490_v12 = vpop.permute.xlu1 %1061  ;;  %v1207_v22 = vand.u32 2147483647, %v1159_v18  ;;  %v1161_v60 = vsub.f32 %v2135_v29, %v1042_v55  ;;  %v803_v19 = vsel %vm767_vm2, %v801_v24, %v802_v20  ;;  %v695_v2 = vand.u32 2147483647, %v647_v59 }
  0xf6   : > { %1313 = vrot.lane.b32.xlu0 %v1201_v5, %s1865_s18  ;;  %1347 = vrot.lane.b32.xlu1 %v1218_v63, %s1865_s18  ;;  %v929_v5 = vadd.f32 %v928_v25, %v927_v14  ;;  %v696_v63 = vand.u32 2147483647, %v648_v52  ;;  %v244_v27 = vsub.f32 %v2132_v28, %v2122_v26  ;;  %v544_v53 = vsel %vm502_vm1, %v542_v21, %v543_v38 }
  0xf7   : > { %v345_v40 = vsel %vm307_vm0, %v284_v0, 0.0  ;;  %v344_v46 = vadd.f32 %v343_v7, %v342_v15  ;;  %v285_v50 = vand.u32 2147483647, %v243_v56  ;;  %v932_v55 = vsel %vm307_vm0, %v803_v19, 0.0 }
  0xf8   : > { %v931_v23 = vadd.f32 %v930_v43, %v929_v5  ;;  %v1163_v61 = vsub.f32 %v2145_v31, %v1046_v51  ;;  %v804_v42 = vrot.slane %v695_v2, 1  ;;  %v805_v9 = vrot.slane %v696_v63, 1  ;;  %v1054_v51 = vpop.permute.xlu0 %1053 }
  0xf9   : > { %v1064_v3 = vpop.permute.xlu1 %1063  ;;  %v649_v26 = vsub.f32 %v2145_v31, %v542_v21  ;;  %v650_v16 = vsub.f32 %v2142_v30, %v544_v53  ;;  %v286_v47 = vand.u32 2147483647, %v244_v27  ;;  %v546_v48 = vrot.slane %v2152_v32, 7 }
  0xfa   : > { %1317 = vrot.lane.b32.xlu0 %v1203_v6, %s1865_s18  ;;  %v1172_v11 = vsub.f32 %v2181_v37, %v1064_v3  ;;  %v1209_v6 = vand.u32 2147483647, %v1161_v60  ;;  %v545_v14 = vrot.slane %v2155_v33, 7  ;;  %v933_v49 = vadd.f32 %v932_v55, %v931_v23 }
  0xfb   : > { %v346_v3 = vadd.f32 %v345_v40, %v344_v46  ;;  %v245_v25 = vsub.f32 %v2145_v31, %v2135_v29  ;;  %v347_v18 = vsel %vm307_vm0, %v285_v50, 0.0  ;;  %v1165_v24 = vsub.f32 %v2155_v33, %v1050_v45 }
  0xfc   : > { %v1220_v58 = vand.u32 2147483647, %v1172_v11  ;;  %v1211_v11 = vand.u32 2147483647, %v1163_v61  ;;  %v806_v59 = vsel %vm767_vm2, %v804_v42, %v805_v9  ;;  %v697_v52 = vand.u32 2147483647, %v649_v26 }
  0xfd   : > { %v2514_v44 = vpop.permute.xlu1 %1065  ;;  %v698_v38 = vand.u32 2147483647, %v650_v16  ;;  %v349_v29 = vsel %vm307_vm0, %v286_v47, 0.0  ;;  %v547_v21 = vsel %vm502_vm1, %v545_v14, %v546_v48  ;;  %v287_v15 = vand.u32 2147483647, %v245_v25 }
  0xfe   : > { %1321 = vrot.lane.b32.xlu0 %v1205_v8, %s1865_s18  ;;  %1351 = vrot.lane.b32.xlu1 %v1220_v58, %s1865_s18  ;;  %v348_v58 = vadd.f32 %v347_v18, %v346_v3  ;;  %v936_v56 = vsel %vm307_vm0, %v806_v59, 0.0  ;;  %v1213_v43 = vand.u32 2147483647, %v1165_v24  ;;  %v1167_v7 = vsub.f32 %v2055_v13, %v1054_v51 }
  0xff   : > { %v807_v60 = vrot.slane %v697_v52, 1  ;;  %v808_v19 = vrot.slane %v698_v38, 1  ;;  %v651_v2 = vsub.f32 %v2155_v33, %v545_v14  ;;  %v652_v63 = vsub.f32 %v2152_v32, %v547_v21 }
 0x100   : > { %v549_v45 = vrot.slane %v2042_v10, 7  ;;  %v548_v27 = vrot.slane %v2055_v13, 7  ;;  %v350_v46 = vadd.f32 %v349_v29, %v348_v58  ;;  %v938_v50 = vsel %vm889_vm3, %v805_v9, 0.0 }
 0x101   : > { %v1068_v1 = vpop.permute.xlu1 %1067  ;;  %v809_v61 = vsel %vm767_vm2, %v807_v60, %v808_v19  ;;  %v700_v42 = vand.u32 2147483647, %v652_v63  ;;  %v551_v18 = vrot.slane %v2169_v35, 7  ;;  %v942_v59 = vsel %vm889_vm3, %v808_v19, 0.0  ;;  %v1734_v63 = vld [vmem:[%s1993_s4 + $0x108] sm:$0xff] }
 0x102   : > { %1325 = vrot.lane.b32.xlu0 %v1207_v22, %s1865_s18  ;;  %v1174_v57 = vsub.f32 %v2191_v39, %v1068_v1  ;;  %v934_v39 = vsel %vm889_vm3, %v802_v20, 0.0  ;;  %v246_v20 = vsub.f32 %v2142_v30, %v2132_v28  ;;  %v1058_v28 = vpop.permute.xlu0 %1057  ;;  %v1215_v1 = vand.u32 2147483647, %v1167_v7 }
 0x103   : > { %v935_v0 = vadd.f32 %v934_v39, %v933_v49  ;;  %v1169_v55 = vsub.f32 %v2169_v35, %v1058_v28  ;;  %v550_v26 = vsel %vm502_vm1, %v548_v27, %v549_v45  ;;  %v940_v47 = vsel %vm307_vm0, %v809_v61, 0.0 }
 0x104   : > { %v1222_v4 = vand.u32 2147483647, %v1174_v57  ;;  %v288_v40 = vand.u32 2147483647, %v246_v20  ;;  %v699_v57 = vand.u32 2147483647, %v651_v2  ;;  %v653_v25 = vsub.f32 %v2055_v13, %v548_v27 }
 0x105   : > { %v2536_v8 = vpop.permute.xlu1 %1069  ;;  %v937_v23 = vadd.f32 %v936_v56, %v935_v0  ;;  %v811_v3 = vrot.slane %v700_v42, 1  ;;  %v654_v51 = vsub.f32 %v2042_v10, %v550_v26  ;;  %v552_v39 = vrot.slane %v2166_v34, 7  ;;  %v2899_v0 = vld [vmem:[#allocation10_spill] sm:$0xff]  ;;  %v1733_v2 = vld [vmem:[%s1993_s4 + $0x100] sm:$0xff] }
 0x106   : > { %1329 = vrot.lane.b32.xlu0 %v1209_v6, %s1865_s18  ;;  %1355 = vrot.lane.b32.xlu1 %v1222_v4, %s1865_s18  ;;  %v351_v6 = vsel %vm307_vm0, %v287_v15, 0.0  ;;  %v353_v9 = vsel %vm307_vm0, %v288_v40, 0.0  ;;  %v1217_v4 = vand.u32 2147483647, %v1169_v55  ;;  %v810_v49 = vrot.slane %v699_v57, 1  ;;  %v1735_v55 = vld [vmem:[%s1993_s4 + $0x110] sm:$0xff] }
 0x107   : > { %v939_v16 = vadd.f32 %v938_v50, %v937_v23  ;;  %v352_v48 = vadd.f32 %v351_v6, %v350_v46  ;;  %v249_v38 = vsub.f32 %v2055_v13, %v2155_v33  ;;  %v701_v34 = vand.u32 2147483647, %v653_v25  ;;  %v2901_v50 = vld [vmem:[#allocation12_spill] sm:$0xff]  ;;  %v1736_v26 = vld [vmem:[%s1993_s4 + $0x118] sm:$0xff] }
 0x108   : > { %v812_v21 = vsel %vm767_vm2, %v810_v49, %v811_v3  ;;  %v702_v20 = vand.u32 2147483647, %v654_v51  ;;  %v250_v35 = vsub.f32 %v2042_v10, %v2152_v32  ;;  %v1173_v15 = vsub.f32 %v2899_v0, %v2514_v44  ;;  %v2900_v10 = vld [vmem:[#allocation11_spill] sm:$0xff]  ;;  %v2610_v49 = vld [vmem:[%s1993_s4 + $0x128] sm:$0xff] }
 0x109   : > { %v1072_v5 = vpop.permute.xlu1 %1071  ;;  %v941_v24 = vadd.f32 %v940_v47, %v939_v16  ;;  %v354_v52 = vadd.f32 %v353_v9, %v352_v48  ;;  %v555_v56 = vrot.slane %v2181_v37, 7  ;;  %v813_v60 = vrot.slane %v701_v34, 1  ;;  %v2605_v16 = vld [vmem:[%s1993_s4 + $0x120] sm:$0xff] }
 0x10a   : > { %1333 = vrot.lane.b32.xlu0 %v1211_v11, %s1865_s18  ;;  %v1176_v22 = vsub.f32 %v2201_v41, %v1072_v5  ;;  %v247_v41 = vsub.f32 %v2155_v33, %v2145_v31  ;;  %v248_v31 = vsub.f32 %v2152_v32, %v2142_v30  ;;  %v1171_v30 = vsub.f32 %v2176_v36, %v2490_v12 }
 0x10b   : > { %v553_v12 = vsel %vm502_vm1, %v551_v18, %v552_v39  ;;  %v943_v33 = vadd.f32 %v942_v59, %v941_v24  ;;  %v554_v5 = vrot.slane %v2176_v36, 7  ;;  %v1175_v32 = vsub.f32 %v2900_v10, %v2536_v8  ;;  %v1739_v10 = vld [vmem:[%s1993_s4 + $0x130] sm:$0xff] }
 0x10c   : > { %v1224_v53 = vand.u32 2147483647, %v1176_v22  ;;  %v289_v14 = vand.u32 2147483647, %v247_v41  ;;  %v290_v11 = vand.u32 2147483647, %v248_v31  ;;  %v655_v44 = vsub.f32 %v1733_v2, %v551_v18 }
 0x10d   : > { %v1219_v58 = vand.u32 2147483647, %v1171_v30  ;;  %v291_v22 = vand.u32 2147483647, %v249_v38  ;;  %v814_v19 = vrot.slane %v702_v20, 1  ;;  %v656_v28 = vsub.f32 %v1734_v63, %v553_v12  ;;  %v1074_v45 = vpop.permute.xlu1 %1073 }
 0x10e   : > { %1337 = vrot.lane.b32.xlu0 %v1213_v43, %s1865_s18  ;;  %1359 = vrot.lane.b32.xlu1 %v1224_v53, %s1865_s18  ;;  %v355_v29 = vsel %vm307_vm0, %v289_v14, 0.0  ;;  %v357_v13 = vsel %vm307_vm0, %v290_v11, 0.0  ;;  %v944_v43 = vsel %vm307_vm0, %v812_v21, 0.0  ;;  %v1221_v36 = vand.u32 2147483647, %v1173_v15 }
 0x10f   : > { %v356_v7 = vadd.f32 %v355_v29, %v354_v52  ;;  %v292_v37 = vand.u32 2147483647, %v250_v35  ;;  %v946_v27 = vsel %vm889_vm3, %v811_v3, 0.0  ;;  %v945_v53 = vadd.f32 %v944_v43, %v943_v33 }
 0x110   : > { %v556_v40 = vsel %vm502_vm1, %v554_v5, %v555_v56  ;;  %v359_v8 = vsel %vm307_vm0, %v291_v22, 0.0  ;;  %v1223_v46 = vand.u32 2147483647, %v1175_v32  ;;  %v1177_v41 = vsub.f32 %v2901_v50, %v1074_v45 }
 0x111   : > { %v358_v23 = vadd.f32 %v357_v13, %v356_v7  ;;  %v251_v6 = vsub.f32 %v1735_v55, %v1733_v2  ;;  %v703_v61 = vand.u32 2147483647, %v655_v44  ;;  %v704_v57 = vand.u32 2147483647, %v656_v28 }
 0x112   : > { %1341 = vrot.lane.b32.xlu0 %v1215_v1, %s1865_s18  ;;  %v815_v1 = vsel %vm767_vm2, %v813_v60, %v814_v19  ;;  %v657_v42 = vsub.f32 %v1735_v55, %v554_v5  ;;  %v658_v9 = vsub.f32 %v1736_v26, %v556_v40  ;;  %v252_v31 = vsub.f32 %v1736_v26, %v1734_v63  ;;  %v2633_v60 = vld [vmem:[%s1993_s4 + $0x138] sm:$0xff] }
 0x113   : > { %v557_v47 = vrot.slane %v2605_v16, 7  ;;  %v947_v48 = vadd.f32 %v946_v27, %v945_v53  ;;  %v948_v14 = vsel %vm307_vm0, %v815_v1, 0.0  ;;  %v558_v3 = vrot.slane %v2610_v49, 7 }
 0x114   : > { %v1225_v25 = vand.u32 2147483647, %v1177_v41  ;;  %v293_v51 = vand.u32 2147483647, %v251_v6  ;;  %v361_v39 = vsel %vm307_vm0, %v292_v37, 0.0  ;;  %v816_v18 = vrot.slane %v703_v61, 1 }
 0x115   : > { %v817_v30 = vrot.slane %v704_v57, 1  ;;  %v705_v11 = vand.u32 2147483647, %v657_v42  ;;  %v2615_v24 = vand.u32 2147483647, %v658_v9  ;;  %v949_v59 = vadd.f32 %v948_v14, %v947_v48  ;;  %v2902_v42 = vld [vmem:[#allocation13_spill] sm:$0xff] }
 0x116   : > { %1345 = vrot.lane.b32.xlu0 %v1217_v4, %s1865_s18  ;;  %v360_v4 = vadd.f32 %v359_v8, %v358_v23  ;;  %v950_v52 = vsel %vm889_vm3, %v814_v19, 0.0  ;;  %v559_v29 = vsel %vm502_vm1, %v557_v47, %v558_v3  ;;  %v294_v21 = vand.u32 2147483647, %v252_v31  ;;  %v2657_v14 = vld [vmem:[%s1993_s4 + $0x140] sm:$0xff]  ;;  %v2661_v3 = vld [vmem:[%s1993_s4 + $0x148] sm:$0xff] }
 0x117   : > { %v253_v34 = vsub.f32 %v2605_v16, %v1735_v55  ;;  %v363_v20 = vsel %vm307_vm0, %v293_v51, 0.0  ;;  %v818_v35 = vsel %vm767_vm2, %v816_v18, %v817_v30  ;;  %v819_v12 = vrot.slane %v705_v11, 1 }
 0x118   : > { %v362_v38 = vadd.f32 %v361_v39, %v360_v4  ;;  %v659_v15 = vsub.f32 %v2605_v16, %v557_v47  ;;  %v951_v13 = vadd.f32 %v950_v52, %v949_v59  ;;  %v660_v33 = vsub.f32 %v2610_v49, %v559_v29  ;;  %v2903_v52 = vld [vmem:[#allocation14_spill] sm:$0xff] }
 0x119   : > { %v952_v5 = vsel %vm307_vm0, %v818_v35, 0.0  ;;  %v254_v43 = vsub.f32 %v2610_v49, %v1736_v26  ;;  %v365_v7 = vsel %vm307_vm0, %v294_v21, 0.0  ;;  %v295_v22 = vand.u32 2147483647, %v253_v34 }
 0x11a   : > { %1349 = vrot.lane.b32.xlu0 %v1219_v58, %s1865_s18  ;;  %v820_v58 = vrot.slane %v2615_v24, 1  ;;  %v364_v56 = vadd.f32 %v363_v20, %v362_v38  ;;  %v560_v32 = vrot.slane %v1739_v10, 7  ;;  %v561_v19 = vrot.slane %v2633_v60, 7 }
 0x11b   : > { %v707_v28 = vand.u32 2147483647, %v659_v15  ;;  %v953_v45 = vadd.f32 %v952_v5, %v951_v13  ;;  %v954_v27 = vsel %vm889_vm3, %v817_v30, 0.0  ;;  %v296_v40 = vand.u32 2147483647, %v254_v43  ;;  %v2904_v43 = vld [vmem:[#allocation15_spill] sm:$0xff] }
 0x11c   : > { %v821_v2 = vsel %vm767_vm2, %v819_v12, %v820_v58  ;;  %v366_v53 = vadd.f32 %v365_v7, %v364_v56  ;;  %v255_v8 = vsub.f32 %v1739_v10, %v2605_v16  ;;  %v367_v23 = vsel %vm307_vm0, %v295_v22, 0.0 }
 0x11d   : > { %v956_v41 = vsel %vm307_vm0, %v821_v2, 0.0  ;;  %v661_v1 = vsub.f32 %v1739_v10, %v560_v32  ;;  %v955_v61 = vadd.f32 %v954_v27, %v953_v45  ;;  %v369_v31 = vsel %vm307_vm0, %v296_v40, 0.0 }
 0x11e   : > { %1353 = vrot.lane.b32.xlu0 %v1221_v36, %s1865_s18  ;;  %v2639_v36 = vand.u32 2147483647, %v660_v33  ;;  %v368_v9 = vadd.f32 %v367_v23, %v366_v53  ;;  %v297_v16 = vand.u32 2147483647, %v255_v8  ;;  %v256_v48 = vsub.f32 %v2633_v60, %v2610_v49 }
 0x11f   : > { %v563_v4 = vrot.slane %v2657_v14, 7  ;;  %v709_v39 = vand.u32 2147483647, %v661_v1  ;;  %v957_v11 = vadd.f32 %v956_v41, %v955_v61  ;;  %v257_v59 = vsub.f32 %v2657_v14, %v1739_v10 }
 0x120   : > { %v823_v57 = vrot.slane %v2639_v36, 1  ;;  %v958_v38 = vsel %vm889_vm3, %v820_v58, 0.0  ;;  %v370_v29 = vadd.f32 %v369_v31, %v368_v9  ;;  %v371_v34 = vsel %vm307_vm0, %v297_v16, 0.0  ;;  %v2905_v31 = vld [vmem:[#allocation9_spill] sm:$0xff] }
 0x121   : > { %v298_v20 = vand.u32 2147483647, %v256_v48  ;;  %v825_v13 = vrot.slane %v709_v39, 1  ;;  %v299_v56 = vand.u32 2147483647, %v257_v59  ;;  %v663_v58 = vsub.f32 %v2657_v14, %v563_v4 }
 0x122   : > { %1357 = vrot.lane.b32.xlu0 %v1223_v46, %s1865_s18  ;;  %v562_v46 = vsel %vm502_vm1, %v560_v32, %v561_v19  ;;  %v959_v22 = vadd.f32 %v958_v38, %v957_v11  ;;  %v2683_v32 = vld [vmem:[%s1993_s4 + $0x150] sm:$0xff]  ;;  %v372_v2 = vadd.f32 %v371_v34, %v370_v29  ;;  %v962_v8 = vsel %vm889_vm3, %v823_v57, 0.0  ;;  %v2722_v38 = vld [vmem:[%s1993_s4 + $0x168] sm:$0xff] }
 0x123   : > { %v662_v47 = vsub.f32 %v2633_v60, %v562_v46  ;;  %v566_v19 = vrot.slane %v2683_v32, 7  ;;  %v373_v27 = vsel %vm307_vm0, %v298_v20, 0.0  ;;  %v711_v23 = vand.u32 2147483647, %v663_v58 }
 0x124   : > { %v259_v41 = vsub.f32 %v2683_v32, %v2657_v14  ;;  %v374_v1 = vadd.f32 %v373_v27, %v372_v2  ;;  %v570_v29 = vrot.slane %v2722_v38, 7 }
 0x125   : > { %v2671_v21 = vand.u32 2147483647, %v662_v47  ;;  %v665_v9 = vsub.f32 %v2683_v32, %v566_v19  ;;  %v828_v48 = vrot.slane %v711_v23, 1 }
 0x126   : > { %1361 = vrot.lane.b32.xlu0 %v1225_v25, %s1865_s18  ;;  %v564_v25 = vrot.slane %v2661_v3, 7  ;;  %v301_v39 = vand.u32 2147483647, %v259_v41 }
 0x127   : > { %v826_v10 = vrot.slane %v2671_v21, 1 }
 0x128   : > { %v2624_v0 = vpop.permute.xlu1 %1281  ;;  %v565_v12 = vsel %vm502_vm1, %v563_v4, %v564_v25 }
 0x12c   : > { %v1076_v44 = vpop.permute.xlu1 %1075  ;;  %v2637_v63 = vpop.permute.xlu0 %1283 }
 0x12d   : > { %v1178_v37 = vsub.f32 %v2252_v54, %v1076_v44  ;;  %v822_v54 = vrot.slane %v707_v28, 1  ;;  %v664_v44 = vsub.f32 %v2661_v3, %v565_v12  ;;  %v2688_v28 = vld [vmem:[%s1993_s4 + $0x158] sm:$0xff] }
 0x12e   : > { %v567_v45 = vrot.slane %v2688_v28, 7  ;;  %v260_v34 = vsub.f32 %v2688_v28, %v2661_v3 }
 0x12f   : > { %v1226_v50 = vand.u32 2147483647, %v1178_v37  ;;  %v824_v24 = vsel %vm767_vm2, %v822_v54, %v823_v57  ;;  %v258_v37 = vsub.f32 %v2661_v3, %v2633_v60  ;;  %v827_v60 = vsel %vm767_vm2, %v825_v13, %v826_v10 }
 0x130   : > { %v1078_v55 = vpop.permute.xlu1 %1077  ;;  %v2647_v6 = vpop.permute.xlu0 %1285  ;;  %v960_v15 = vsel %vm307_vm0, %v824_v24, 0.0  ;;  %v568_v57 = vsel %vm502_vm1, %v566_v19, %v567_v45  ;;  %v964_v25 = vsel %vm307_vm0, %v827_v60, 0.0  ;;  %v302_v19 = vand.u32 2147483647, %v260_v34 }
 0x131   : > { %v1179_v26 = vsub.f32 %v2902_v42, %v1078_v55  ;;  %1363 = vrot.lane.b32.xlu1 %v1226_v50, %s1865_s18  ;;  %v961_v50 = vadd.f32 %v960_v15, %v959_v22  ;;  %v2701_v55 = vand.u32 2147483647, %v664_v44  ;;  %v300_v61 = vand.u32 2147483647, %v258_v37 }
 0x132   : > { %v375_v42 = vsel %vm307_vm0, %v299_v56, 0.0  ;;  %v666_v4 = vsub.f32 %v2688_v28, %v568_v57  ;;  %v966_v15 = vsel %vm889_vm3, %v826_v10, 0.0  ;;  %v1427_v22 = vsel %vm1425_vm4, %v2637_v63, 0.0 }
 0x133   : > { %v1227_v51 = vand.u32 2147483647, %v1179_v26  ;;  %v963_v47 = vadd.f32 %v962_v8, %v961_v50  ;;  %v376_v14 = vadd.f32 %v375_v42, %v374_v1  ;;  %v829_v11 = vrot.slane %v2701_v55, 1 }
 0x134   : > { %v1080_v18 = vpop.permute.xlu1 %1079  ;;  %v2664_v30 = vpop.permute.xlu0 %1287  ;;  %v714_v56 = vand.u32 2147483647, %v666_v4  ;;  %v1426_v10 = vsel %vm1425_vm4, %v2624_v0, 0.0  ;;  %v1429_v37 = vsel %vm1425_vm4, %v2647_v6, 0.0  ;;  %v573_v0 = vrot.slane %v2071_v17, 7 }
 0x135   : > { %v1180_v49 = vsub.f32 %v2903_v52, %v1080_v18  ;;  %1365 = vrot.lane.b32.xlu0 %v1227_v51, %s1865_s18  ;;  %v377_v18 = vsel %vm307_vm0, %v300_v61, 0.0  ;;  %v2718_v52 = vld [vmem:[%s1993_s4 + $0x160] sm:$0xff]  ;;  %v965_v20 = vadd.f32 %v964_v25, %v963_v47  ;;  %v830_v58 = vsel %vm767_vm2, %v828_v48, %v829_v11 }
 0x136   : > { %v378_v12 = vadd.f32 %v377_v18, %v376_v14  ;;  %v261_v3 = vsub.f32 %v2718_v52, %v2683_v32  ;;  %v1428_v8 = vadd.f32 %v1427_v22, %v1426_v10  ;;  %v262_v32 = vsub.f32 %v2722_v38, %v2688_v28 }
 0x137   : > { %v1228_v35 = vand.u32 2147483647, %v1180_v49  ;;  %v569_v49 = vrot.slane %v2718_v52, 7  ;;  %v967_v2 = vadd.f32 %v966_v15, %v965_v20  ;;  %v1431_v50 = vsel %vm1425_vm4, %v2664_v30, 0.0 }
 0x138   : > { %v1082_v33 = vpop.permute.xlu1 %1081  ;;  %v2676_v5 = vpop.permute.xlu0 %1289  ;;  %v303_v41 = vand.u32 2147483647, %v261_v3  ;;  %v381_v1 = vsel %vm307_vm0, %v302_v19, 0.0  ;;  %v1430_v55 = vadd.f32 %v1429_v37, %v1428_v8  ;;  %v970_v60 = vsel %vm889_vm3, %v829_v11, 0.0 }
 0x139   : > { %v1181_v7 = vsub.f32 %v2904_v43, %v1082_v33  ;;  %1367 = vrot.lane.b32.xlu1 %v1228_v35, %s1865_s18  ;;  %v713_v35 = vand.u32 2147483647, %v665_v9  ;;  %v379_v33 = vsel %vm307_vm0, %v301_v39, 0.0  ;;  %v667_v45 = vsub.f32 %v2718_v52, %v569_v49 }
 0x13a   : > { %v380_v44 = vadd.f32 %v379_v33, %v378_v12  ;;  %v1432_v57 = vadd.f32 %v1431_v50, %v1430_v55  ;;  %v263_v9 = vsub.f32 %v2905_v31, %v2718_v52  ;;  %v304_v48 = vand.u32 2147483647, %v262_v32 }
 0x13b   : > { %v1229_v36 = vand.u32 2147483647, %v1181_v7  ;;  %v571_v7 = vsel %vm502_vm1, %v569_v49, %v570_v29  ;;  %v831_v27 = vrot.slane %v713_v35, 1  ;;  %v715_v61 = vand.u32 2147483647, %v667_v45 }
 0x13c   : > { %v1084_v53 = vpop.permute.xlu1 %1083  ;;  %v2694_v40 = vpop.permute.xlu0 %1291  ;;  %v668_v63 = vsub.f32 %v2722_v38, %v571_v7  ;;  %v382_v30 = vadd.f32 %v381_v1, %v380_v44  ;;  %v383_v14 = vsel %vm307_vm0, %v303_v41, 0.0  ;;  %v305_v34 = vand.u32 2147483647, %v263_v9 }
 0x13d   : > { %v1182_v46 = vsub.f32 %v2321_v62, %v1084_v53  ;;  %1369 = vrot.lane.b32.xlu0 %v1229_v36, %s1865_s18  ;;  %v968_v36 = vsel %vm307_vm0, %v830_v58, 0.0  ;;  %v832_v53 = vrot.slane %v714_v56, 1  ;;  %v1435_v47 = vsel %vm1425_vm4, %v2694_v40, 0.0 }
 0x13e   : > { %v969_v6 = vadd.f32 %v968_v36, %v967_v2  ;;  %v716_v42 = vand.u32 2147483647, %v668_v63  ;;  %v834_v11 = vrot.slane %v715_v61, 1  ;;  %v264_v40 = vsub.f32 %v2071_v17, %v2722_v38 }
 0x13f   : > { %v1230_v54 = vand.u32 2147483647, %v1182_v46  ;;  %v572_v46 = vrot.slane %v2905_v31, 7  ;;  %v833_v28 = vsel %vm767_vm2, %v831_v27, %v832_v53  ;;  %v384_v29 = vadd.f32 %v383_v14, %v382_v30 }
 0x140   : > { %v1086_v26 = vpop.permute.xlu1 %1085  ;;  %v2706_v62 = vpop.permute.xlu0 %1293  ;;  %v971_v4 = vadd.f32 %v970_v60, %v969_v6  ;;  %v306_v7 = vand.u32 2147483647, %v264_v40 }
 0x141   : > { %v1183_v16 = vsub.f32 %v2905_v31, %v1086_v26  ;;  %1371 = vrot.lane.b32.xlu1 %v1230_v54, %s1865_s18  ;;  %v1433_v54 = vsel %vm1425_vm4, %v2676_v5, 0.0  ;;  %v669_v25 = vsub.f32 %v2905_v31, %v572_v46  ;;  %v1437_v39 = vsel %vm1425_vm4, %v2706_v62, 0.0 }
 0x142   : > { %v1434_v5 = vadd.f32 %v1433_v54, %v1432_v57  ;;  %v385_v31 = vsel %vm307_vm0, %v304_v48, 0.0  ;;  %v974_v62 = vsel %vm889_vm3, %v832_v53, 0.0  ;;  %v389_v27 = vsel %vm307_vm0, %v306_v7, 0.0 }
 0x143   : > { %v1231_v51 = vand.u32 2147483647, %v1183_v16  ;;  %v574_v16 = vsel %vm502_vm1, %v572_v46, %v573_v0  ;;  %v717_v15 = vand.u32 2147483647, %v669_v25 }
 0x144   : > { %v1088_v24 = vpop.permute.xlu1 %1087  ;;  %v2715_v59 = vpop.permute.xlu0 %1295  ;;  %v670_v18 = vsub.f32 %v2071_v17, %v574_v16  ;;  %v1436_v52 = vadd.f32 %v1435_v47, %v1434_v5 }
 0x145   : > { %v1184_v21 = vsub.f32 %v2071_v17, %v1088_v24  ;;  %1373 = vrot.lane.b32.xlu0 %v1231_v51, %s1865_s18  ;;  %v972_v51 = vsel %vm307_vm0, %v833_v28, 0.0  ;;  %v835_v24 = vrot.slane %v716_v42, 1  ;;  %v386_v17 = vadd.f32 %v385_v31, %v384_v29 }
 0x146   : > { %v973_v20 = vadd.f32 %v972_v51, %v971_v4  ;;  %v1438_v35 = vadd.f32 %v1437_v39, %v1436_v52  ;;  %v837_v10 = vrot.slane %v717_v15, 1 }
 0x147   : > { %v1232_v13 = vand.u32 2147483647, %v1184_v21  ;;  %v1439_v21 = vsel %vm1425_vm4, %v2715_v59, 0.0  ;;  %v836_v33 = vsel %vm767_vm2, %v834_v11, %v835_v24  ;;  %v387_v59 = vsel %vm307_vm0, %v305_v34, 0.0 }
 0x148   : > { %v1298_v43 = vpop.permute.xlu0 %1297  ;;  %v1440_v56 = vadd.f32 %v1439_v21, %v1438_v35  ;;  %v975_v22 = vadd.f32 %v974_v62, %v973_v20  ;;  %v976_v19 = vsel %vm307_vm0, %v836_v33, 0.0  ;;  %v1316_v36 = vpop.permute.xlu1 %1315  ;;  %v388_v37 = vadd.f32 %v387_v59, %v386_v17 }
 0x149   : > { %1375 = vrot.lane.b32.xlu1 %v1232_v13, %s1865_s18  ;;  %v1441_v12 = vsel %vm1425_vm4, %v1298_v43, 0.0  ;;  %v718_v13 = vand.u32 2147483647, %v670_v18  ;;  %v1459_v25 = vsel %vm1425_vm4, %v1316_v36, 0.0 }
 0x14a   : > { %v1442_v3 = vadd.f32 %v1441_v12, %v1440_v56  ;;  %v977_v53 = vadd.f32 %v976_v19, %v975_v22  ;;  %v390_v41 = vadd.f32 %v389_v27, %v388_v37 }
 0x14b   : > { %v838_v43 = vrot.slane %v718_v13, 1 }
 0x14c   : > { %v1300_v23 = vpop.permute.xlu0 %1299  ;;  %v1320_v60 = vpop.permute.xlu1 %1319 }
 0x14d   : > { %v1443_v38 = vsel %vm1425_vm4, %v1300_v23, 0.0  ;;  %v978_v23 = vsel %vm889_vm3, %v835_v24, 0.0  ;;  %v839_v46 = vsel %vm767_vm2, %v837_v10, %v838_v43  ;;  %v982_v30 = vsel %vm889_vm3, %v838_v43, 0.0 }
 0x14e   : > { %v1444_v44 = vadd.f32 %v1443_v38, %v1442_v3  ;;  %v979_v6 = vadd.f32 %v978_v23, %v977_v53  ;;  %v980_v54 = vsel %vm307_vm0, %v839_v46, 0.0  ;;  %v1463_v52 = vsel %vm1425_vm4, %v1320_v60, 0.0 }
 0x150   : > { %v1302_v26 = vpop.permute.xlu0 %1301  ;;  %v1324_v47 = vpop.permute.xlu1 %1323 }
 0x151   : > { %v1445_v2 = vsel %vm1425_vm4, %v1302_v26, 0.0  ;;  %v981_v26 = vadd.f32 %v980_v54, %v979_v6  ;;  %v1467_v34 = vsel %vm1425_vm4, %v1324_v47, 0.0 }
 0x152   : > { %v1446_v8 = vadd.f32 %v1445_v2, %v1444_v44 }
 0x153   : > { %v983_v4 = vadd.f32 %v982_v30, %v981_v26 }
 0x154   : > { %v1304_v49 = vpop.permute.xlu0 %1303  ;;  %v1328_v11 = vpop.permute.xlu1 %1327 }
 0x155   : > { %v1447_v63 = vsel %vm1425_vm4, %v1304_v49, 0.0  ;;  %v1471_v15 = vsel %vm1425_vm4, %v1328_v11, 0.0 }
 0x156   : > { %v1448_v0 = vadd.f32 %v1447_v63, %v1446_v8 }
 0x158   : > { %v1306_v58 = vpop.permute.xlu0 %1305  ;;  %v1332_v31 = vpop.permute.xlu1 %1331 }
 0x159   : > { %v1449_v32 = vsel %vm1425_vm4, %v1306_v58, 0.0  ;;  %v1475_v38 = vsel %vm1425_vm4, %v1332_v31, 0.0 }
 0x15a   : > { %v1450_v55 = vadd.f32 %v1449_v32, %v1448_v0 }
 0x15c   : > { %v1308_v45 = vpop.permute.xlu0 %1307  ;;  %v1336_v58 = vpop.permute.xlu1 %1335 }
 0x15d   : > { %v1451_v1 = vsel %vm1425_vm4, %v1308_v45, 0.0  ;;  %v1479_v19 = vsel %vm1425_vm4, %v1336_v58, 0.0 }
 0x15e   : > { %v1452_v42 = vadd.f32 %v1451_v1, %v1450_v55 }
 0x160   : > { %v1310_v50 = vpop.permute.xlu0 %1309  ;;  %v1340_v2 = vpop.permute.xlu1 %1339 }
 0x161   : > { %v1453_v61 = vsel %vm1425_vm4, %v1310_v50, 0.0  ;;  %v1483_v36 = vsel %vm1425_vm4, %v1340_v2, 0.0 }
 0x162   : > { %v1454_v9 = vadd.f32 %v1453_v61, %v1452_v42 }
 0x164   : > { %v1312_v28 = vpop.permute.xlu0 %1311  ;;  %391 = vadd.xlane.f32.xlu0 %v390_v41  ;;  %v1344_v53 = vpop.permute.xlu1 %1343 }
 0x165   : > { %v1455_v57 = vsel %vm1425_vm4, %v1312_v28, 0.0  ;;  %v1487_v32 = vsel %vm1425_vm4, %v1344_v53, 0.0 }
 0x166   : > { %v1456_v16 = vadd.f32 %v1455_v57, %v1454_v9 }
 0x168   : > { %v1314_v48 = vpop.permute.xlu0 %1313  ;;  %v1348_v50 = vpop.permute.xlu1 %1347 }
 0x169   : > { %v1457_v14 = vsel %vm1425_vm4, %v1314_v48, 0.0  ;;  %v1491_v6 = vsel %vm1425_vm4, %v1348_v50, 0.0 }
 0x16a   : > { %v1458_v5 = vadd.f32 %v1457_v14, %v1456_v16 }
 0x16c   : > { %v1460_v51 = vadd.f32 %v1459_v25, %v1458_v5  ;;  %v1318_v39 = vpop.permute.xlu0 %1317 }
 0x16d   : > { %v1461_v18 = vsel %vm1425_vm4, %v1318_v39, 0.0  ;;  %984 = vadd.xlane.f32.xlu1 %v983_v4 }
 0x16e   : > { %v1462_v24 = vadd.f32 %v1461_v18, %v1460_v51 }
 0x170   : > { %v1464_v49 = vadd.f32 %v1463_v52, %v1462_v24  ;;  %v1322_v40 = vpop.permute.xlu0 %1321  ;;  %v1352_v54 = vpop.permute.xlu1 %1351 }
 0x171   : > { %v1465_v29 = vsel %vm1425_vm4, %v1322_v40, 0.0  ;;  %v1495_v28 = vsel %vm1425_vm4, %v1352_v54, 0.0 }
 0x172   : > { %v1466_v21 = vadd.f32 %v1465_v29, %v1464_v49 }
 0x174   : > { %v1468_v20 = vadd.f32 %v1467_v34, %v1466_v21  ;;  %v1326_v35 = vpop.permute.xlu0 %1325 }
 0x175   : > { %v1469_v62 = vsel %vm1425_vm4, %v1326_v35, 0.0 }
 0x176   : > { %v1470_v12 = vadd.f32 %v1469_v62, %v1468_v20 }
 0x178   : > { %v1472_v13 = vadd.f32 %v1471_v15, %v1470_v12  ;;  %v1330_v33 = vpop.permute.xlu0 %1329  ;;  %v1356_v9 = vpop.permute.xlu1 %1355 }
 0x179   : > { %v1473_v56 = vsel %vm1425_vm4, %v1330_v33, 0.0  ;;  %v1499_v47 = vsel %vm1425_vm4, %v1356_v9, 0.0 }
 0x17a   : > { %v1474_v17 = vadd.f32 %v1473_v56, %v1472_v13 }
 0x17c   : > { %v1476_v7 = vadd.f32 %v1475_v38, %v1474_v17  ;;  %v1334_v59 = vpop.permute.xlu0 %1333 }
 0x17d   : > { %v1477_v22 = vsel %vm1425_vm4, %v1334_v59, 0.0 }
 0x17e   : > { %v1478_v3 = vadd.f32 %v1477_v22, %v1476_v7 }
 0x180   : > { %v1480_v10 = vadd.f32 %v1479_v19, %v1478_v3  ;;  %v1338_v43 = vpop.permute.xlu0 %1337  ;;  %v1360_v4 = vpop.permute.xlu1 %1359 }
 0x181   : > { %v1481_v44 = vsel %vm1425_vm4, %v1338_v43, 0.0  ;;  %v1503_v25 = vsel %vm1425_vm4, %v1360_v4, 0.0 }
 0x182   : > { %v1482_v45 = vadd.f32 %v1481_v44, %v1480_v10 }
 0x184   : > { %v1484_v37 = vadd.f32 %v1483_v36, %v1482_v45  ;;  %v1342_v63 = vpop.permute.xlu0 %1341 }
 0x185   : > { %v1485_v27 = vsel %vm1425_vm4, %v1342_v63, 0.0 }
 0x186   : > { %v1486_v8 = vadd.f32 %v1485_v27, %v1484_v37 }
 0x188   : > { %v1346_v23 = vpop.permute.xlu0 %1345  ;;  %v1488_v46 = vadd.f32 %v1487_v32, %v1486_v8 }
 0x189   : > { %v1489_v0 = vsel %vm1425_vm4, %v1346_v23, 0.0 }
 0x18a   : > { %v1490_v41 = vadd.f32 %v1489_v0, %v1488_v46 }
 0x18c   : > { %v1350_v1 = vpop.permute.xlu0 %1349  ;;  %v1492_v55 = vadd.f32 %v1491_v6, %v1490_v41  ;;  %v216_v6 = vlaneseq }
 0x18d   : > { %v1493_v60 = vsel %vm1425_vm4, %v1350_v1, 0.0 }
 0x18e   : > { %v1494_v61 = vadd.f32 %v1493_v60, %v1492_v55  ;;  %v217_v55 = vshrl.u32 %v216_v6, 7 }
 0x190   : > { %v1354_v42 = vpop.permute.xlu0 %1353  ;;  %v1496_v57 = vadd.f32 %v1495_v28, %v1494_v61  ;;  %vm1532_vm5 = vcmp.eq.s32.totalorder %v217_v55, 1  ;;  %vm1531_vm6 = vcmp.eq.s32.totalorder %v217_v55, 0 }
 0x191   : > { %v1497_v26 = vsel %vm1425_vm4, %v1354_v42, 0.0 }
 0x192   : > { %v1498_v30 = vadd.f32 %v1497_v26, %v1496_v57 }
 0x194   : > { %v1358_v16 = vpop.permute.xlu0 %1357  ;;  %v1500_v48 = vadd.f32 %v1499_v47, %v1498_v30 }
 0x195   : > { %v1501_v14 = vsel %vm1425_vm4, %v1358_v16, 0.0 }
 0x196   : > { %v1502_v5 = vadd.f32 %v1501_v14, %v1500_v48 }
 0x198   : > { %v1362_v51 = vpop.permute.xlu0 %1361  ;;  %v1504_v39 = vadd.f32 %v1503_v25, %v1502_v5 }
 0x199   : > { %v1505_v11 = vsel %vm1425_vm4, %v1362_v51, 0.0 }
 0x19a   : > { %v1506_v49 = vadd.f32 %v1505_v11, %v1504_v39 }
 0x1a3   : > { %v1364_v18 = vpop.permute.xlu1 %1363 }
 0x1a4   : > { %v1507_v52 = vsel %vm1425_vm4, %v1364_v18, 0.0 }
 0x1a5   : > { %v1508_v21 = vadd.f32 %v1507_v52, %v1506_v49 }
 0x1a7   : > { %v1366_v24 = vpop.permute.xlu0 %1365 }
 0x1a8   : > { %v1509_v29 = vsel %vm1425_vm4, %v1366_v24, 0.0 }
 0x1a9   : > { %v1510_v20 = vadd.f32 %v1509_v29, %v1508_v21 }
 0x1ab   : > { %v1368_v40 = vpop.permute.xlu1 %1367 }
 0x1ac   : > { %v1511_v31 = vsel %vm1425_vm4, %v1368_v40, 0.0 }
 0x1ad   : > { %v1512_v12 = vadd.f32 %v1511_v31, %v1510_v20 }
 0x1af   : > { %v1370_v34 = vpop.permute.xlu0 %1369 }
 0x1b0   : > { %v1513_v62 = vsel %vm1425_vm4, %v1370_v34, 0.0 }
 0x1b1   : > { %v1514_v13 = vadd.f32 %v1513_v62, %v1512_v12 }
 0x1b3   : > { %v1372_v35 = vpop.permute.xlu1 %1371 }
 0x1b4   : > { %v1515_v15 = vsel %vm1425_vm4, %v1372_v35, 0.0 }
 0x1b5   : > { %v1516_v58 = vadd.f32 %v1515_v15, %v1514_v13 }
 0x1b7   : > { %v1374_v33 = vpop.permute.xlu0 %1373 }
 0x1b8   : > { %v1517_v56 = vsel %vm1425_vm4, %v1374_v33, 0.0 }
 0x1b9   : > { %v1518_v17 = vadd.f32 %v1517_v56, %v1516_v58 }
 0x1bb   : > { %v1376_v38 = vpop.permute.xlu1 %1375 }
 0x1bc   : > { %v1519_v7 = vsel %vm1425_vm4, %v1376_v38, 0.0 }
 0x1bd   : > { %v1520_v59 = vadd.f32 %v1519_v7, %v1518_v17 }
 0x1bf   : > { %1521 = vadd.xlane.f32.xlu0 %v1520_v59 }
 0x1f1   : > { %v392_v22 = vpop.xlane.xlu0 %391 }
 0x1f2   : > { %v393_v3 = vrot.slane %v392_v22, 4 }
 0x1f4   : > { %v394_v19 = vadd.f32 %v393_v3, %v392_v22 }
 0x1f6   : > { %v395_v2 = vrot.slane %v394_v19, 2 }
 0x1f8   : > { %v396_v10 = vadd.f32 %v395_v2, %v394_v19 }
 0x1fa   : > { %v985_v43 = vpop.xlane.xlu1 %984  ;;  %v397_v44 = vrot.slane %v396_v10, 1 }
 0x1fb   : > { %v986_v45 = vrot.slane %v985_v43, 4 }
 0x1fc   : > { %v398_v36 = vadd.f32 %v397_v44, %v396_v10 }
 0x1fd   : > { %v987_v37 = vadd.f32 %v986_v45, %v985_v43 }
 0x1fe   : > { %1660 = vpush %v398_v36 }
 0x1ff   : > { %v988_v63 = vrot.slane %v987_v37, 2 }
 0x201   : > { %v989_v27 = vadd.f32 %v988_v63, %v987_v37 }
 0x203   : > { %v990_v53 = vrot.slane %v989_v27, 1 }
 0x205   : > { %v991_v8 = vadd.f32 %v990_v53, %v989_v27 }
 0x207   : > { %1662 = vpush %v991_v8 }
 0x22f   : > { %s1661_s30 = spop %1660 }
 0x230   : > { %v1536_v61 = vstv %s1661_s30 }
 0x238   : > { %s1663_s2 = spop %1662 }
 0x239   : > { %v1533_v60 = vstv %s1663_s2 }
 0x24c   : > { %v1522_v23 = vpop.xlane.xlu0 %1521 }
 0x24d   : > { %v1523_v32 = vrot.slane %v1522_v23, 4 }
 0x24f   : > { %v1524_v46 = vadd.f32 %v1523_v32, %v1522_v23 }
 0x251   : > { %v1525_v0 = vrot.slane %v1524_v46, 2 }
 0x253   : > { %v1526_v50 = vadd.f32 %v1525_v0, %v1524_v46 }
 0x255   : > { %v1527_v41 = vrot.slane %v1526_v50, 1 }
 0x257   : > { %v1528_v1 = vadd.f32 %v1527_v41, %v1526_v50 }
 0x259   : > { %1664 = vpush %v1528_v1 }
 0x28a   : > { %s1665_s5 = spop %1664 }
 0x28b   : > { %v1534_v54 = vstv %s1665_s5 }
 0x28c   : > { %v1535_v42 = vsel %vm1532_vm5, %v1533_v60, %v1534_v54 }
 0x28d   : > { %v1537_v28 = vsel %vm1531_vm6, %v1536_v61, %v1535_v42 }
 0x28e   : > { %1539 = vst [vmem:[%s164_s13] sm:$0xff] %v1537_v28 }
 0x28f   : > { %1790 = shalt.err (!%p1787_p4)
}
 0x290   : > { %s1791_s27 = scalar_lea.hbm %s2826_s22, 128  ;;  %s1795_s25 = scalar_lea.hbm %s2876_s1, 256 }
 0x291   : > { %p1792_p6 = scmp.ne.s32.totalorder %s2826_s22, %s1791_s27  ;;  %p1796_p12 = scmp.lt.u32.totalorder %s2826_s22, %s2876_s1 }
 0x292   : > { %p1797_p1 = scmp.lt.u32.totalorder %s1795_s25, %s1791_s27  ;;  %p1799_p8 = scmp.lt.u32.totalorder %s1791_s27, %s2826_s22 }
 0x293   : > { %p1793_p7 = pnand %p1792_p6, %p2906_p9 }
 0x294   : > { %p1798_p3 = por %p1797_p1, %p1796_p12 }
 0x295   : > { %p1794_p10 = pneg %p1793_p7 }
 0x296   : > { %p1800_p11 = por %p1799_p8, %p1798_p3 }
 0x298   : > { %p1801_p0 = pnand %p1800_p11, %p1794_p10 }
 0x29a   : > { %1804 = shalt.err (!%p1801_p0)
}
 0x29b   : > { %1668 = dma.vmem_to_hbm [thread:$0]  (%p2906_p9), %s2828_s15, 128, %s2826_s22, %s1541_s23  }
 0x29c PF: > { %s1568_s30 = sand.u32 1, %s1839_s6   ;;  %p2907_p5 = scmp.ne.s32.totalorder %s2889_s21, 0 }
 0x29d   : > { %p2908_p13 = scmp.ge.s32.totalorder %s1859_s11, 2  ;;  %s1569_s2 = scalar_lea.sflag [#allocation5], %s1568_s30 }
 0x29f   : > { %p1675_p2 = pnand %p2908_p13, %p2907_p5 }
 0x2a1   : > { %1834 = dma.done.wait (!%p1675_p2), %s1569_s2, 128  }
 0x2a2   : > { %1836 = vsyncadd (!%p1675_p2), %s1569_s2, 4294967168  ;;  %s17_s11 = sadd.s32 1, %s1859_s11   ;;  %s2909_s6 = smov %s1843_s7 }
 0x2a3   : > { %p14_p4 = scmp.ge.s32.totalorder %s17_s11, 4   ;;  %s2910_s7 = smov %s1847_s8 }
 0x2a4   : > { %s2911_s8 = smov %s1933_s20  ;;  %s2912_s9 = smov %s1855_s10 }
 0x2a5   : > { %s2913_s10 = smov %s2915_s14  ;;  %16 = sbr.rel (!%p14_p4) target bundleno = 6 (0x6), region = 77 }
 0x2ac   :  { %1574 = vsyncpa [#allocation4], 1 }
 0x2ad   :  { %1576 = vsyncpa [#allocation4 + $0x1], 1 }
 0x2ae   :  { %1577 = vsyncpa [#allocation5], 1 }
 0x2af   :  { %1579 = vsyncpa [#allocation5 + $0x1], 1 }

</bundles_post_ra>
